<compile_context>
chip_gen: v6e
topology: v6e:2x2x1
jax: 0.10.0
libtpu: 0.0.40
codegen_flags: <defaults>
</compile_context>

<pallas_src>
import functools

import jax
import jax.numpy as jnp
from jax.experimental import pallas as pl
from jax.experimental.pallas import tpu as pltpu


def _round_up(v, m):
    return (v + m - 1) // m * m


# ----------------------------------------------------------------------------
# Fused per-sample kernel:
#   3x3 conv (in-kernel tap accumulation) + bias + ReLU + global avg pool
#   + cat(pooled, y) + classifier Linear.
#
# The padded image is flattened to (P, Cin) rows (row s <-> padded position
# (s // Wp2, s % Wp2)).  For tap (di, dj) the needed inputs form the contiguous
# row range [di*Wp2 + dj, di*Wp2 + dj + Ls); rows whose column index is >= W
# ("phantom" columns created by the flatten trick) are masked out of the pool.
# ----------------------------------------------------------------------------
def _fused_kernel(x_ref, w_ref, bc_ref, m_ref, y_ref, wcls_ref, bcls_ref,
                  o_ref, *, Ls, Wp2):
    # --- 3x3 conv as 9 shifted matmuls (bf16 operands, f32 accumulation). ---
    def tap(t):
        off = (t // 3) * Wp2 + (t % 3)          # static offsets
        lhs = x_ref[0, off:off + Ls, :]         # (Ls, Cinp) bf16
        return jnp.dot(lhs, w_ref[t], preferred_element_type=jnp.float32)

    acc = tap(0)
    for t in range(1, 9):
        acc = acc + tap(t)                      # (Ls, Coutp) f32

    # --- bias + ReLU fused, then masked global average pool. ---
    feat = jnp.maximum(acc + bc_ref[...], 0.0)
    # m_ref holds 1/(H*W) on real rows and 0 on phantom rows -> pooled mean.
    pooled = jnp.sum(feat * m_ref[...], axis=0, keepdims=True)   # (1, Coutp)

    # --- cat((pooled, y), -1) @ W_cls^T + b_cls.
    # y was pre-placed into the spare zero lanes of the pooled vector, and the
    # classifier weight rows are stacked to match -> a single MXU matmul. ---
    aug = pooled + y_ref[0]                                      # (1, Coutp)
    logits = jnp.dot(aug, wcls_ref[...], preferred_element_type=jnp.float32)
    o_ref[0] = logits + bcls_ref[...]


def densenet_finetune_forward(x, y, params):
    """x: (N, Cin, H, W) f32 NCHW, y: (N, Dy) f32.  Returns (N, num_classes)."""
    conv_w, conv_b = params["conv_w"], params["conv_b"]
    cls_w, cls_b = params["cls_w"], params["cls_b"]

    N, Cin, H, W = x.shape
    Cout = conv_w.shape[0]
    Dy = y.shape[1]
    ncls = cls_w.shape[0]

    Wp2 = W + 2                           # padded width
    P = (H + 2) * Wp2                     # flattened padded spatial length
    Ls = H * Wp2                          # tap-slab length (covers all outputs)
    P_pad = _round_up(P + 2, 8)           # slack so every tap slab is in-bounds
    Cinp = _round_up(Cin, 8)              # aligned contraction dim
    Coutp = _round_up(Cout + Dy, 128)     # spare lanes carry y for fused head
    Kp = _round_up(ncls, 128)             # lane-dense output

    # Activations: NCHW -> NHWC, zero halo, flatten spatial, bf16 (built once).
    x_nhwc = jnp.transpose(x, (0, 2, 3, 1)).astype(jnp.bfloat16)
    xpad = jnp.pad(x_nhwc, ((0, 0), (1, 1), (1, 1), (0, Cinp - Cin)))
    xflat = jnp.pad(xpad.reshape(N, P, Cinp), ((0, 0), (0, P_pad - P), (0, 0)))

    # Conv weights per tap: (Cout, Cin, 3, 3) -> (9, Cinp, Coutp) bf16.
    w9 = jnp.transpose(conv_w, (2, 3, 1, 0)).reshape(9, Cin, Cout)
    w9 = jnp.pad(w9, ((0, 0), (0, Cinp - Cin), (0, Coutp - Cout))).astype(jnp.bfloat16)
    bconv = jnp.zeros((1, Coutp), jnp.float32).at[0, :Cout].set(conv_b.astype(jnp.float32))

    # Pool mask: 1/(H*W) on real rows, 0 on phantom columns (folds mean scale).
    rows = jnp.arange(Ls, dtype=jnp.int32)
    mask = jnp.where(rows % Wp2 < W, 1.0 / (H * W), 0.0)
    mask = mask.astype(jnp.float32).reshape(Ls, 1)

    # y placed into the spare zero lanes of the pooled vector; classifier
    # weight stacked so one matmul computes cat(pooled, y) @ W_cls^T.
    yslab = jnp.zeros((N, 1, Coutp), jnp.float32)
    yslab = yslab.at[:, 0, Cout:Cout + Dy].set(y.astype(jnp.float32))
    wt = cls_w.T.astype(jnp.float32)                    # (Cout + Dy, ncls)
    wcls = jnp.zeros((Coutp, Kp), jnp.float32).at[:Cout + Dy, :ncls].set(wt)
    bcls = jnp.zeros((1, Kp), jnp.float32).at[0, :ncls].set(cls_b.astype(jnp.float32))

    out = pl.pallas_call(
        functools.partial(_fused_kernel, Ls=Ls, Wp2=Wp2),
        grid=(N,),
        out_shape=jax.ShapeDtypeStruct((N, 1, Kp), jnp.float32),
        in_specs=[
            pl.BlockSpec((1, P_pad, Cinp), lambda n: (n, 0, 0)),     # xflat
            pl.BlockSpec((9, Cinp, Coutp), lambda n: (0, 0, 0)),     # conv w (resident)
            pl.BlockSpec((1, Coutp), lambda n: (0, 0)),              # conv bias
            pl.BlockSpec((Ls, 1), lambda n: (0, 0)),                 # pool mask
            pl.BlockSpec((1, 1, Coutp), lambda n: (n, 0, 0)),        # y slab
            pl.BlockSpec((Coutp, Kp), lambda n: (0, 0)),             # classifier w
            pl.BlockSpec((1, Kp), lambda n: (0, 0)),                 # classifier bias
        ],
        out_specs=pl.BlockSpec((1, 1, Kp), lambda n: (n, 0, 0)),
        compiler_params=pltpu.CompilerParams(
            dimension_semantics=("parallel",),
            vmem_limit_bytes=32 * 1024 * 1024,
        ),
    )(xflat, w9, bconv, mask, yslab, wcls, bcls)

    return out[:, 0, :ncls]


def _reference(x, y, params):
    """Pure-JAX reference for a correctness sanity check."""
    feats = jax.lax.conv_general_dilated(
        x, params["conv_w"], window_strides=(1, 1), padding="SAME",
        dimension_numbers=("NCHW", "OIHW", "NCHW"),
    ) + params["conv_b"].reshape(1, -1, 1, 1)
    out = jnp.maximum(feats, 0.0)
    out = out.mean(axis=(2, 3))                       # avg_pool2d over full H, W -> view
    out = jnp.concatenate([out, y], axis=-1)
    return out @ params["cls_w"].T + params["cls_b"]


if __name__ == "__main__":
    key = jax.random.PRNGKey(0)
    k_x, k_y, k_cw, k_cb, k_lw, k_lb = jax.random.split(key, 6)

    N, Cin, H, W = 2, 3, 16, 16        # small NCHW image batch
    C_feat = 32                        # surrogate of densenet121's 1024 feature channels
    Dy = 1                             # extra scalar per sample concatenated before classifier
    num_classes = 10

    x = jax.random.normal(k_x, (N, Cin, H, W), dtype=jnp.float32)
    y = jax.random.normal(k_y, (N, Dy), dtype=jnp.float32)

    params = {
        # surrogate net.features: one 3x3 conv
        "conv_w": 0.1 * jax.random.normal(k_cw, (C_feat, Cin, 3, 3), dtype=jnp.float32),
        "conv_b": 0.1 * jax.random.normal(k_cb, (C_feat,), dtype=jnp.float32),
        # net.classifier = nn.Linear(in_features, num_classes); forward feeds cat(features, y)
        "cls_w": 0.1 * jax.random.normal(k_lw, (num_classes, C_feat + Dy), dtype=jnp.float32),
        "cls_b": 0.1 * jax.random.normal(k_lb, (num_classes,), dtype=jnp.float32),
    }

    out = jax.block_until_ready(densenet_finetune_forward(x, y, params))
    ref = jax.block_until_ready(_reference(x, y, params))

    assert out.shape == (N, num_classes), out.shape
    # bf16 MXU operands vs f32 reference -> ~1e-3 level differences expected.
    assert jnp.allclose(out, ref, atol=2e-2, rtol=2e-2), "mismatch vs reference"
    print("KERNEL_OK")
</pallas_src>

<mosaic_0001>
module attributes {stable_mosaic.version = 11 : i64} {
  func.func @_fused_kernel(%arg0: i32, %arg1: memref<1x328x8xbf16, #tpu.memory_space<vmem>>, %arg2: memref<9x8x128xbf16, #tpu.memory_space<vmem>>, %arg3: memref<1x128xf32, #tpu.memory_space<vmem>>, %arg4: memref<288x1xf32, #tpu.memory_space<vmem>>, %arg5: memref<1x1x128xf32, #tpu.memory_space<vmem>>, %arg6: memref<128x128xf32, #tpu.memory_space<vmem>>, %arg7: memref<1x128xf32, #tpu.memory_space<vmem>>, %arg8: memref<1x1x128xf32, #tpu.memory_space<vmem>>) attributes {dimension_semantics = [#tpu.dimension_semantics<parallel>], iteration_bounds = array<i64: 2>, scalar_prefetch = 0 : i64, scratch_operands = 0 : i64, tpu.core_type = #tpu.core_type<tc>, window_params = [{transform_indices = @transform_0, window_bounds = array<i64: 1, 328, 8>}, {pipeline_mode = #tpu.pipeline_mode<synchronous>, transform_indices = @transform_1, window_bounds = array<i64: 9, 8, 128>}, {pipeline_mode = #tpu.pipeline_mode<synchronous>, transform_indices = @transform_2, window_bounds = array<i64: 1, 128>}, {pipeline_mode = #tpu.pipeline_mode<synchronous>, transform_indices = @transform_3, window_bounds = array<i64: 288, 1>}, {transform_indices = @transform_4, window_bounds = array<i64: 1, 1, 128>}, {pipeline_mode = #tpu.pipeline_mode<synchronous>, transform_indices = @transform_5, window_bounds = array<i64: 128, 128>}, {pipeline_mode = #tpu.pipeline_mode<synchronous>, transform_indices = @transform_6, window_bounds = array<i64: 1, 128>}, {transform_indices = @transform_7, window_bounds = array<i64: 1, 1, 128>}]} {
    %c0 = arith.constant 0 : index
    %c0_0 = arith.constant 0 : index
    %c0_1 = arith.constant 0 : index
    %0 = vector.load %arg1[%c0, %c0_0, %c0_1] : memref<1x328x8xbf16, #tpu.memory_space<vmem>>, vector<1x288x8xbf16>
    %1 = vector.shape_cast %0 : vector<1x288x8xbf16> to vector<288x8xbf16>
    %c0_2 = arith.constant 0 : index
    %c0_3 = arith.constant 0 : index
    %c0_4 = arith.constant 0 : index
    %2 = vector.load %arg2[%c0_2, %c0_3, %c0_4] : memref<9x8x128xbf16, #tpu.memory_space<vmem>>, vector<1x8x128xbf16>
    %3 = vector.shape_cast %2 : vector<1x8x128xbf16> to vector<8x128xbf16>
    %cst = arith.constant dense<0.000000e+00> : vector<288x128xf32>
    %4 = tpu.matmul %1, %3, %cst {dimension_numbers = #tpu.dot_dimension_numbers<[1], [0], [0], [1], [0, 0, 1, 1], [], []>} : vector<288x8xbf16>, vector<8x128xbf16>, vector<288x128xf32> -> vector<288x128xf32>
    %c0_5 = arith.constant 0 : index
    %c1 = arith.constant 1 : index
    %c0_6 = arith.constant 0 : index
    %5 = vector.load %arg1[%c0_5, %c1, %c0_6] : memref<1x328x8xbf16, #tpu.memory_space<vmem>>, vector<1x288x8xbf16>
    %6 = vector.shape_cast %5 : vector<1x288x8xbf16> to vector<288x8xbf16>
    %c1_7 = arith.constant 1 : index
    %c0_8 = arith.constant 0 : index
    %c0_9 = arith.constant 0 : index
    %7 = vector.load %arg2[%c1_7, %c0_8, %c0_9] : memref<9x8x128xbf16, #tpu.memory_space<vmem>>, vector<1x8x128xbf16>
    %8 = vector.shape_cast %7 : vector<1x8x128xbf16> to vector<8x128xbf16>
    %cst_10 = arith.constant dense<0.000000e+00> : vector<288x128xf32>
    %9 = tpu.matmul %6, %8, %cst_10 {dimension_numbers = #tpu.dot_dimension_numbers<[1], [0], [0], [1], [0, 0, 1, 1], [], []>} : vector<288x8xbf16>, vector<8x128xbf16>, vector<288x128xf32> -> vector<288x128xf32>
    %10 = arith.addf %4, %9 : vector<288x128xf32>
    %c0_11 = arith.constant 0 : index
    %c2 = arith.constant 2 : index
    %c0_12 = arith.constant 0 : index
    %11 = vector.load %arg1[%c0_11, %c2, %c0_12] : memref<1x328x8xbf16, #tpu.memory_space<vmem>>, vector<1x288x8xbf16>
    %12 = vector.shape_cast %11 : vector<1x288x8xbf16> to vector<288x8xbf16>
    %c2_13 = arith.constant 2 : index
    %c0_14 = arith.constant 0 : index
    %c0_15 = arith.constant 0 : index
    %13 = vector.load %arg2[%c2_13, %c0_14, %c0_15] : memref<9x8x128xbf16, #tpu.memory_space<vmem>>, vector<1x8x128xbf16>
    %14 = vector.shape_cast %13 : vector<1x8x128xbf16> to vector<8x128xbf16>
    %cst_16 = arith.constant dense<0.000000e+00> : vector<288x128xf32>
    %15 = tpu.matmul %12, %14, %cst_16 {dimension_numbers = #tpu.dot_dimension_numbers<[1], [0], [0], [1], [0, 0, 1, 1], [], []>} : vector<288x8xbf16>, vector<8x128xbf16>, vector<288x128xf32> -> vector<288x128xf32>
    %16 = arith.addf %10, %15 : vector<288x128xf32>
    %c0_17 = arith.constant 0 : index
    %c18 = arith.constant 18 : index
    %c0_18 = arith.constant 0 : index
    %17 = vector.load %arg1[%c0_17, %c18, %c0_18] : memref<1x328x8xbf16, #tpu.memory_space<vmem>>, vector<1x288x8xbf16>
    %18 = vector.shape_cast %17 : vector<1x288x8xbf16> to vector<288x8xbf16>
    %c3 = arith.constant 3 : index
    %c0_19 = arith.constant 0 : index
    %c0_20 = arith.constant 0 : index
    %19 = vector.load %arg2[%c3, %c0_19, %c0_20] : memref<9x8x128xbf16, #tpu.memory_space<vmem>>, vector<1x8x128xbf16>
    %20 = vector.shape_cast %19 : vector<1x8x128xbf16> to vector<8x128xbf16>
    %cst_21 = arith.constant dense<0.000000e+00> : vector<288x128xf32>
    %21 = tpu.matmul %18, %20, %cst_21 {dimension_numbers = #tpu.dot_dimension_numbers<[1], [0], [0], [1], [0, 0, 1, 1], [], []>} : vector<288x8xbf16>, vector<8x128xbf16>, vector<288x128xf32> -> vector<288x128xf32>
    %22 = arith.addf %16, %21 : vector<288x128xf32>
    %c0_22 = arith.constant 0 : index
    %c19 = arith.constant 19 : index
    %c0_23 = arith.constant 0 : index
    %23 = vector.load %arg1[%c0_22, %c19, %c0_23] : memref<1x328x8xbf16, #tpu.memory_space<vmem>>, vector<1x288x8xbf16>
    %24 = vector.shape_cast %23 : vector<1x288x8xbf16> to vector<288x8xbf16>
    %c4 = arith.constant 4 : index
    %c0_24 = arith.constant 0 : index
    %c0_25 = arith.constant 0 : index
    %25 = vector.load %arg2[%c4, %c0_24, %c0_25] : memref<9x8x128xbf16, #tpu.memory_space<vmem>>, vector<1x8x128xbf16>
    %26 = vector.shape_cast %25 : vector<1x8x128xbf16> to vector<8x128xbf16>
    %cst_26 = arith.constant dense<0.000000e+00> : vector<288x128xf32>
    %27 = tpu.matmul %24, %26, %cst_26 {dimension_numbers = #tpu.dot_dimension_numbers<[1], [0], [0], [1], [0, 0, 1, 1], [], []>} : vector<288x8xbf16>, vector<8x128xbf16>, vector<288x128xf32> -> vector<288x128xf32>
    %28 = arith.addf %22, %27 : vector<288x128xf32>
    %c0_27 = arith.constant 0 : index
    %c20 = arith.constant 20 : index
    %c0_28 = arith.constant 0 : index
    %29 = vector.load %arg1[%c0_27, %c20, %c0_28] : memref<1x328x8xbf16, #tpu.memory_space<vmem>>, vector<1x288x8xbf16>
    %30 = vector.shape_cast %29 : vector<1x288x8xbf16> to vector<288x8xbf16>
    %c5 = arith.constant 5 : index
    %c0_29 = arith.constant 0 : index
    %c0_30 = arith.constant 0 : index
    %31 = vector.load %arg2[%c5, %c0_29, %c0_30] : memref<9x8x128xbf16, #tpu.memory_space<vmem>>, vector<1x8x128xbf16>
    %32 = vector.shape_cast %31 : vector<1x8x128xbf16> to vector<8x128xbf16>
    %cst_31 = arith.constant dense<0.000000e+00> : vector<288x128xf32>
    %33 = tpu.matmul %30, %32, %cst_31 {dimension_numbers = #tpu.dot_dimension_numbers<[1], [0], [0], [1], [0, 0, 1, 1], [], []>} : vector<288x8xbf16>, vector<8x128xbf16>, vector<288x128xf32> -> vector<288x128xf32>
    %34 = arith.addf %28, %33 : vector<288x128xf32>
    %c0_32 = arith.constant 0 : index
    %c36 = arith.constant 36 : index
    %c0_33 = arith.constant 0 : index
    %35 = vector.load %arg1[%c0_32, %c36, %c0_33] : memref<1x328x8xbf16, #tpu.memory_space<vmem>>, vector<1x288x8xbf16>
    %36 = vector.shape_cast %35 : vector<1x288x8xbf16> to vector<288x8xbf16>
    %c6 = arith.constant 6 : index
    %c0_34 = arith.constant 0 : index
    %c0_35 = arith.constant 0 : index
    %37 = vector.load %arg2[%c6, %c0_34, %c0_35] : memref<9x8x128xbf16, #tpu.memory_space<vmem>>, vector<1x8x128xbf16>
    %38 = vector.shape_cast %37 : vector<1x8x128xbf16> to vector<8x128xbf16>
    %cst_36 = arith.constant dense<0.000000e+00> : vector<288x128xf32>
    %39 = tpu.matmul %36, %38, %cst_36 {dimension_numbers = #tpu.dot_dimension_numbers<[1], [0], [0], [1], [0, 0, 1, 1], [], []>} : vector<288x8xbf16>, vector<8x128xbf16>, vector<288x128xf32> -> vector<288x128xf32>
    %40 = arith.addf %34, %39 : vector<288x128xf32>
    %c0_37 = arith.constant 0 : index
    %c37 = arith.constant 37 : index
    %c0_38 = arith.constant 0 : index
    %41 = vector.load %arg1[%c0_37, %c37, %c0_38] : memref<1x328x8xbf16, #tpu.memory_space<vmem>>, vector<1x288x8xbf16>
    %42 = vector.shape_cast %41 : vector<1x288x8xbf16> to vector<288x8xbf16>
    %c7 = arith.constant 7 : index
    %c0_39 = arith.constant 0 : index
    %c0_40 = arith.constant 0 : index
    %43 = vector.load %arg2[%c7, %c0_39, %c0_40] : memref<9x8x128xbf16, #tpu.memory_space<vmem>>, vector<1x8x128xbf16>
    %44 = vector.shape_cast %43 : vector<1x8x128xbf16> to vector<8x128xbf16>
    %cst_41 = arith.constant dense<0.000000e+00> : vector<288x128xf32>
    %45 = tpu.matmul %42, %44, %cst_41 {dimension_numbers = #tpu.dot_dimension_numbers<[1], [0], [0], [1], [0, 0, 1, 1], [], []>} : vector<288x8xbf16>, vector<8x128xbf16>, vector<288x128xf32> -> vector<288x128xf32>
    %46 = arith.addf %40, %45 : vector<288x128xf32>
    %c0_42 = arith.constant 0 : index
    %c38 = arith.constant 38 : index
    %c0_43 = arith.constant 0 : index
    %47 = vector.load %arg1[%c0_42, %c38, %c0_43] : memref<1x328x8xbf16, #tpu.memory_space<vmem>>, vector<1x288x8xbf16>
    %48 = vector.shape_cast %47 : vector<1x288x8xbf16> to vector<288x8xbf16>
    %c8 = arith.constant 8 : index
    %c0_44 = arith.constant 0 : index
    %c0_45 = arith.constant 0 : index
    %49 = vector.load %arg2[%c8, %c0_44, %c0_45] : memref<9x8x128xbf16, #tpu.memory_space<vmem>>, vector<1x8x128xbf16>
    %50 = vector.shape_cast %49 : vector<1x8x128xbf16> to vector<8x128xbf16>
    %cst_46 = arith.constant dense<0.000000e+00> : vector<288x128xf32>
    %51 = tpu.matmul %48, %50, %cst_46 {dimension_numbers = #tpu.dot_dimension_numbers<[1], [0], [0], [1], [0, 0, 1, 1], [], []>} : vector<288x8xbf16>, vector<8x128xbf16>, vector<288x128xf32> -> vector<288x128xf32>
    %52 = arith.addf %46, %51 : vector<288x128xf32>
    %c0_47 = arith.constant 0 : index
    %c0_48 = arith.constant 0 : index
    %53 = vector.load %arg3[%c0_47, %c0_48] : memref<1x128xf32, #tpu.memory_space<vmem>>, vector<1x128xf32>
    %54 = vector.broadcast %53 : vector<1x128xf32> to vector<288x128xf32>
    %55 = arith.addf %52, %54 : vector<288x128xf32>
    %cst_49 = arith.constant 0.000000e+00 : f32
    %56 = vector.broadcast %cst_49 : f32 to vector<288x128xf32>
    %57 = arith.maximumf %55, %56 : vector<288x128xf32>
    %c0_50 = arith.constant 0 : index
    %c0_51 = arith.constant 0 : index
    %58 = vector.load %arg4[%c0_50, %c0_51] : memref<288x1xf32, #tpu.memory_space<vmem>>, vector<288x1xf32>
    %59 = vector.broadcast %58 : vector<288x1xf32> to vector<288x128xf32>
    %60 = arith.mulf %57, %59 : vector<288x128xf32>
    %cst_52 = arith.constant dense<0.000000e+00> : vector<128xf32>
    %61 = vector.multi_reduction <add>, %60, %cst_52 [0] : vector<288x128xf32> to vector<128xf32>
    %62 = vector.shape_cast %61 : vector<128xf32> to vector<1x128xf32>
    %c0_53 = arith.constant 0 : index
    %c0_54 = arith.constant 0 : index
    %c0_55 = arith.constant 0 : index
    %63 = vector.load %arg5[%c0_53, %c0_54, %c0_55] : memref<1x1x128xf32, #tpu.memory_space<vmem>>, vector<1x1x128xf32>
    %64 = vector.shape_cast %63 : vector<1x1x128xf32> to vector<1x128xf32>
    %65 = arith.addf %62, %64 : vector<1x128xf32>
    %c0_56 = arith.constant 0 : index
    %c0_57 = arith.constant 0 : index
    %66 = vector.load %arg6[%c0_56, %c0_57] : memref<128x128xf32, #tpu.memory_space<vmem>>, vector<128x128xf32>
    %cst_58 = arith.constant dense<0.000000e+00> : vector<1x128xf32>
    %67 = tpu.matmul %65, %66, %cst_58 {dimension_numbers = #tpu.dot_dimension_numbers<[1], [0], [0], [1], [0, 0, 1, 1], [], []>} : vector<1x128xf32>, vector<128x128xf32>, vector<1x128xf32> -> vector<1x128xf32>
    %c0_59 = arith.constant 0 : index
    %c0_60 = arith.constant 0 : index
    %68 = vector.load %arg7[%c0_59, %c0_60] : memref<1x128xf32, #tpu.memory_space<vmem>>, vector<1x128xf32>
    %69 = arith.addf %67, %68 : vector<1x128xf32>
    %c0_61 = arith.constant 0 : index
    %c0_62 = arith.constant 0 : index
    %c0_63 = arith.constant 0 : index
    %70 = vector.load %arg8[%c0_61, %c0_62, %c0_63] : memref<1x1x128xf32, #tpu.memory_space<vmem>>, vector<1x1x128xf32>
    %71 = vector.shape_cast %70 : vector<1x1x128xf32> to vector<1x128xf32>
    %72 = vector.shape_cast %69 : vector<1x128xf32> to vector<1x1x128xf32>
    tpu.vector_store %arg8[%c0_61, %c0_62, %c0_63], %72 {strides = array<i32>} : memref<1x1x128xf32, #tpu.memory_space<vmem>>, vector<1x1x128xf32>,
    return
  }
  func.func @transform_0(%arg0: i32) -> (i32, i32, i32) {
    %c0_i32 = arith.constant 0 : i32
    %c0_i32_0 = arith.constant 0 : i32
    %c0_i32_1 = arith.constant 0 : i32
    return %arg0, %c0_i32, %c0_i32_0 : i32, i32, i32
  }
  func.func @transform_1(%arg0: i32) -> (i32, i32, i32) {
    %c0_i32 = arith.constant 0 : i32
    %c0_i32_0 = arith.constant 0 : i32
    %c0_i32_1 = arith.constant 0 : i32
    %c0_i32_2 = arith.constant 0 : i32
    return %c0_i32, %c0_i32_0, %c0_i32_1 : i32, i32, i32
  }
  func.func @transform_2(%arg0: i32) -> (i32, i32) {
    %c0_i32 = arith.constant 0 : i32
    %c0_i32_0 = arith.constant 0 : i32
    %c0_i32_1 = arith.constant 0 : i32
    return %c0_i32, %c0_i32_0 : i32, i32
  }
  func.func @transform_3(%arg0: i32) -> (i32, i32) {
    %c0_i32 = arith.constant 0 : i32
    %c0_i32_0 = arith.constant 0 : i32
    %c0_i32_1 = arith.constant 0 : i32
    return %c0_i32, %c0_i32_0 : i32, i32
  }
  func.func @transform_4(%arg0: i32) -> (i32, i32, i32) {
    %c0_i32 = arith.constant 0 : i32
    %c0_i32_0 = arith.constant 0 : i32
    %c0_i32_1 = arith.constant 0 : i32
    return %arg0, %c0_i32, %c0_i32_0 : i32, i32, i32
  }
  func.func @transform_5(%arg0: i32) -> (i32, i32) {
    %c0_i32 = arith.constant 0 : i32
    %c0_i32_0 = arith.constant 0 : i32
    %c0_i32_1 = arith.constant 0 : i32
    return %c0_i32, %c0_i32_0 : i32, i32
  }
  func.func @transform_6(%arg0: i32) -> (i32, i32) {
    %c0_i32 = arith.constant 0 : i32
    %c0_i32_0 = arith.constant 0 : i32
    %c0_i32_1 = arith.constant 0 : i32
    return %c0_i32, %c0_i32_0 : i32, i32
  }
  func.func @transform_7(%arg0: i32) -> (i32, i32, i32) {
    %c0_i32 = arith.constant 0 : i32
    %c0_i32_0 = arith.constant 0 : i32
    %c0_i32_1 = arith.constant 0 : i32
    return %arg0, %c0_i32, %c0_i32_0 : i32, i32, i32
  }
}

</mosaic_0001>

<bundles_post_ra>
// kernel: tpu_custom_call.1
= control target key start
LH: loop header
LB: loop body
LE: loop exit
PB: predicated region body
PF: predicated region fallthrough
CT: control target
= control target key end

     0   :  { %12 = vsyncpa [#allocation3], 0  ;;  %s6983_s0 = inlined_call_operand.vmem [shape: bf16[2,328,8], index: 0, kind: input, shape index: {}]   ;;  %s6984_s1 = inlined_call_operand.vmem [shape: bf16[9,8,128], index: 1, kind: input, shape index: {}]   ;;  %s6985_s2 = inlined_call_operand.vmem [shape: f32[1,128], index: 2, kind: input, shape index: {}]   ;;  %s6986_s3 = inlined_call_operand.vmem [shape: f32[288,1], index: 3, kind: input, shape index: {}]   ;;  %s6987_s4 = inlined_call_operand.vmem [shape: f32[2,1,128], index: 4, kind: input, shape index: {}]   ;;  %s6988_s5 = inlined_call_operand.vmem [shape: f32[128,128], index: 5, kind: input, shape index: {}]   ;;  %s6989_s6 = inlined_call_operand.vmem [shape: f32[1,128], index: 6, kind: input, shape index: {}]   ;;  %s6990_s7 = inlined_call_operand.hbm [shape: f32[2,1,128], index: 7, kind: output, shape index: {}]  }
   0x1   :  { %14 = vsyncpa [#allocation3 + $0x1], 0  ;;  %s5309_s24 = smov 0   ;;  %s5311_s25 = smov 0  }
   0x2   :  { %s5313_s26 = smov 0   ;;  %s5315_s27 = smov 0  }
   0x3 LB: > { %s5330_s28 = sadd.s32 4294967295, %s5263_s27   ;;  %s4278_s29 = sadd.s32 4294967294, %s5263_s27   ;;  %s5263_s27 = sphi %s5315_s27, %s7044_s27   ;;  %s5259_s26 = sphi %s5313_s26, %s7043_s26   ;;  %s5255_s25 = sphi %s5311_s25, %s7042_s25   ;;  %s5251_s24 = sphi %s5309_s24, %s7041_s24  }
   0x4   : > { %s5334_s30 = sadd.s32 1, %s5263_s27   ;;  %s184_s8 = sadd.s32 1, %s5259_s26 }
   0x5   : > { %s181_s9 = ssub.s32 %s5263_s27, %s5334_s30  ;;  %p194_p0 = scmp.ne.s32.totalorder %s5259_s26, %s5255_s25 }
   0x6   : > { %p182_p1 = scmp.eq.s32.totalorder %s181_s9, 0  ;;  %p195_p2 = scmp.eq.s32.totalorder %s5330_s28, 1 }
   0x7   : > { %p200_p3 = scmp.ne.s32.totalorder %s5255_s25, %s5251_s24  ;;  %p201_p4 = scmp.eq.s32.totalorder %s4278_s29, 1 }
   0x8   : > { %s5345_s10 = scalar_select %p182_p1, %s5259_s26, %s184_s8  }
   0x9   : > { %p5347_p5 = por %p195_p2, %p194_p0  ;;  %p5351_p6 = por %p201_p4, %p200_p3 }
   0xa   : > { %p4281_p7 = scmp.ge.s32.totalorder %s5263_s27, 1  ;;  %p248_p8 = scmp.lt.s32.totalorder %s5263_s27, 3 }
   0xc   : > { %p249_p9 = pnand %p4281_p7, %p248_p8 }
   0xe   : > { %252 = sbr.rel (%p249_p9) target bundleno = 792 (0x318), region = 48 }
  0x13   : > { %v4283_v0 = vld [vmem:[%s6984_s1 + $0x4] sm:$0xf]  ;;  %vm628_vm0 = vcmask 1043456   ;;  %p282_p10 = scmp.lt.s32.totalorder %s5330_s28, 1  ;;  %v4339_v2 = vld [vmem:[%s6984_s1 + $0x8] sm:$0xf] }
  0x14   : > { %5086 = vmatprep.subr.msk.bf16.mxu0 %vm628_vm0, %v4283_v0  ;;  %5087 = vmatprep.subr.msk.bf16.mxu1 %vm628_vm0, %v4283_v0  ;;  %v630_v1 = vsel %vm628_vm0, %v4283_v0, 0  ;;  %v327_v3 = vld [vmem:[%s6984_s1] sm:$0xf]  ;;  %vm424_vm1 = vsmask.f32 7424  ;;  %vm573_vm2 = vcmask 64512  }
  0x15   : > { %4708 = vmatpush3.bf16.msra.mxu0 %v630_v1  ;;  %5085 = vmatpush3.bf16.msra.mxu1 %v630_v1  ;;  %s5371_s19 = scalar_select %p282_p10, %s5330_s28, 1  ;;  %v1124_v8 = vsel %vm628_vm0, %v4339_v2, 0  ;;  %v846_v16 = vsel %vm628_vm0, %v327_v3, 0  ;;  %v5424_v33 = vld [vmem:[%s6984_s1 + $0x10] sm:$0xf]  ;;  %vm1031_vm3 = vcmask 1046528  }
  0x16   : > { %5089 = vmatprep.subr.msk.bf16.mxu0 %vm628_vm0, %v4339_v2  ;;  %5088 = vmatprep.subr.msk.bf16.mxu1 %vm628_vm0, %v327_v3  ;;  %v5444_v45 = vld [vmem:[%s6984_s1 + $0xc] sm:$0xf]  ;;  %vm2231_vm4 = vcmask 1045504   ;;  %vm1784_vm5 = vsmask.f32 6400  ;;  %vm3431_vm6 = vcmask 1044480  }
  0x17   : > { %s5096_s20 = smul.u32 164, %s5371_s19  ;;  %vm2984_vm7 = vsmask.f32 5376  ;;  %vm5267_vm8 = vmmov 0   ;;  %s280_s21 = sand.u32 1, %s5255_s25  }
  0x18   : > { %s4516_s29 = sshll.u32 %s5330_s28, 4  ;;  %s281_s8 = scalar_lea.vmem [#allocation2], %s280_s21 }
  0x19   : > { %s5379_s23 = scalar_lea.vmem %s6983_s0, %s5096_s20  ;;  %s289_s20 = scalar_lea.vmem %s6987_s4, %s5371_s19 }
  0x1a   : > { %v291_v4 = vld [vmem:[%s5379_s23] sm:$0xf]  ;;  %v5383_v5 = vld [vmem:[%s5379_s23 + $0x4] sm:$0xf]  ;;  %v5389_v7 = vld [vmem:[%s5379_s23 + $0x8] sm:$0xff]   ;;  %s4214_s9 = sshll.u32 %s281_s8, 4  ;;  %s6948_s19 = scalar_lea.hbm %s6990_s7, %s4516_s29  ;;  %s4215_s9 = int_to_ptr.vmem [resolvable:$true] %s4214_s9 }
  0x1b   : > { %v5386_v6 = vcombine.low %v291_v4, %v5383_v5  ;;  %v433_v11 = vshll.u32 %v5389_v7, 16  ;;  %v437_v12 = vshrl.u32 %v5389_v7, 16  ;;  %v5397_v13 = vld [vmem:[%s5379_s23 + $0x50] sm:$0xff]   ;;  %v5400_v14 = vld [vmem:[%s5379_s23 + $0x58] sm:$0xff]   ;;  %v5412_v24 = vld [vmem:[%s5379_s23 + $0x60] sm:$0xff]   ;;  %s4202_s15 = scalar_lea.sflag [#allocation3], %s280_s21 }
  0x1c   : > { %v5403_v15 = vld [vmem:[%s5379_s23 + $0x10] sm:$0xff]   ;;  %v505_v19 = vshll.u32 %v5397_v13, 16  ;;  %v509_v20 = vshrl.u32 %v5397_v13, 16  ;;  %v513_v21 = vshll.u32 %v5400_v14, 16  ;;  %v517_v22 = vshrl.u32 %v5400_v14, 16  ;;  %v5417_v28 = vld [vmem:[%s5379_s23 + $0x18] sm:$0xff]  }
  0x1d   : > { %v426_v9 = vshrl.u32 %v5386_v6, 16  ;;  %v428_v10 = vshll.u32 %v5386_v6, 16  ;;  %v435_v18 = vrot.slane %v433_v11, 1  ;;  %v441_v23 = vshll.u32 %v5403_v15, 16  ;;  %v5430_v37 = vld [vmem:[%s5379_s23 + $0x68] sm:$0xff]   ;;  %v5434_v39 = vld [vmem:[%s5379_s23 + $0x20] sm:$0xff]  }
  0x1e   : > { %v5414_v27 = vrot.slane %v505_v19, 1  ;;  %v515_v29 = vrot.slane %v513_v21, 1  ;;  %v521_v31 = vshll.u32 %v5412_v24, 16  ;;  %v445_v32 = vshrl.u32 %v5403_v15, 16  ;;  %v5439_v44 = vld [vmem:[%s5379_s23 + $0x70] sm:$0xff]   ;;  %v5451_v50 = vld [vmem:[%s5379_s23 + $0x28] sm:$0xff]  }
  0x1f   : > { %v430_v17 = vrot.slane %v428_v10, 1  ;;  %v439_v26 = vor.u32 %v437_v12, %v435_v18  ;;  %v443_v30 = vrot.slane %v441_v23, 1  ;;  %v449_v36 = vshll.u32 %v5417_v28, 16  ;;  %v5466_v62 = vld [vmem:[%s5379_s23 + $0x78] sm:$0xff]   ;;  %v5476_v10 = vld [vmem:[%s5379_s23 + $0x30] sm:$0xff]   ;;  %v5479_v11 = vld [vmem:[%s5379_s23 + $0x80] sm:$0xff]  }
  0x20   : > { %v511_v35 = vor.u32 %v509_v20, %v5414_v27  ;;  %v525_v38 = vshrl.u32 %v5412_v24, 16  ;;  %v519_v40 = vor.u32 %v517_v22, %v515_v29  ;;  %v523_v42 = vrot.slane %v521_v31, 1  ;;  %v5488_v23 = vld [vmem:[%s5379_s23 + $0x38] sm:$0xff]   ;;  %s5203_s16 = scalar_lea.vmem %s4215_s9, 16  ;;  %s5268_s17 = smov [#allocation2]  }
  0x21   : > { %v431_v25 = vor.u32 %v430_v17, %v426_v9  ;;  %v444_v41 = vsel %vm424_vm1, %v439_v26, %v443_v30  ;;  %v447_v43 = vor.u32 %v445_v32, %v443_v30  ;;  %v451_v47 = vrot.slane %v449_v36, 1  ;;  %v5493_v26 = vld [vmem:[%s5379_s23 + $0x88] sm:$0xff]   ;;  %p5204_p11 = scmp.ne.s32.totalorder %s4215_s9, %s5203_s16  ;;  %s5207_s28 = sshll.u32 %s5268_s17, 4  ;;  %s5208_s28 = int_to_ptr.vmem [resolvable:$false] %s5207_s28 }
  0x22   : > { %v516_v46 = vsel %vm424_vm1, %v511_v35, %v515_v29  ;;  %v529_v48 = vshll.u32 %v5430_v37, 16  ;;  %v453_v49 = vshrl.u32 %v5417_v28, 16  ;;  %v524_v51 = vsel %vm424_vm1, %v519_v40, %v523_v42  ;;  %v5505_v40 = vld [vmem:[%s5379_s23 + $0x48] sm:$0xff]   ;;  %s5209_s18 = scalar_lea.vmem %s5208_s28, 32  ;;  %p5210_p0 = scmp.lt.s32.totalorder %s4215_s9, %s5208_s28 }
  0x23   : > { %v436_v34 = vsel %vm424_vm1, %v431_v25, %v435_v18  ;;  %4729 = vmatprep.mubr.msk.bf16.mxu1 %vm573_vm2, %v516_v46  ;;  %v527_v52 = vor.u32 %v525_v38, %v523_v42  ;;  %v457_v53 = vshll.u32 %v5434_v39, 16  ;;  %v533_v54 = vshrl.u32 %v5430_v37, 16  ;;  %v5502_v38 = vld [vmem:[%s5379_s23 + $0x40] sm:$0xff]   ;;  %p5205_p12 = pnand %p5204_p11, %p5347_p5  ;;  %p5211_p1 = scmp.lt.s32.totalorder %s5209_s18, %s5203_s16 }
  0x24   : > { %4709 = vmatprep.mubr.msk.bf16.mxu0 %vm573_vm2, %v436_v34  ;;  %4730 = vmatmul.mubr.msk.bf16.vlgmr.msra.gmra.mxu1 %vm573_vm2, %v524_v51  ;;  %v452_v55 = vsel %vm424_vm1, %v447_v43, %v451_v47  ;;  %v531_v56 = vrot.slane %v529_v48, 1  ;;  %v455_v57 = vor.u32 %v453_v49, %v451_v47  ;;  %v537_v58 = vshll.u32 %v5439_v44, 16  ;;  %v5158_v43 = vld [vmem:[%s5379_s23 + $0x90] ss:$0 sps:$4 sm:$0x11]  }
  0x25   : > { %4710 = vmatmul.mubr.msk.bf16.vlgmr.msra.gmra.mxu0 %vm573_vm2, %v444_v41  ;;  %4746 = vmatpush3.bf16.msra.mxu1 %v846_v16  ;;  %v459_v59 = vrot.slane %v457_v53, 1  ;;  %v461_v60 = vshrl.u32 %v5434_v39, 16  ;;  %v465_v61 = vshll.u32 %v5451_v50, 16  ;;  %v541_v2 = vshrl.u32 %v5439_v44, 16  ;;  %p5206_p13 = pneg %p5205_p12  ;;  %p5212_p2 = por %p5211_p1, %p5210_p0 }
  0x26   : > { %4784 = vmatpush3.bf16.msra.mxu0 %v1124_v8  ;;  %4713 = vmatprep.mubr.msk.bf16.mxu0 %vm573_vm2, %v452_v55  ;;  %v532_v63 = vsel %vm424_vm1, %v527_v52, %v531_v56  ;;  %v535_v0 = vor.u32 %v533_v54, %v531_v56  ;;  %v539_v1 = vrot.slane %v537_v58, 1  ;;  %v545_v9 = vshll.u32 %v5466_v62, 16 }
  0x27   : > { %5091 = vmatprep.subr.msk.bf16.mxu0 %vm628_vm0, %v5424_v33  ;;  %5090 = vmatprep.subr.msk.bf16.mxu1 %vm628_vm0, %v5444_v45  ;;  %v460_v3 = vsel %vm424_vm1, %v455_v57, %v459_v59  ;;  %v463_v4 = vor.u32 %v461_v60, %v459_v59  ;;  %v467_v8 = vrot.slane %v465_v61, 1  ;;  %v469_v17 = vshrl.u32 %v5451_v50, 16  ;;  %p5213_p3 = pnand %p5212_p2, %p5206_p13 }
  0x28   : > { %4733 = vmatprep.mubr.msk.bf16.mxu1 %vm573_vm2, %v532_v63  ;;  %v540_v12 = vsel %vm424_vm1, %v535_v0, %v539_v1  ;;  %v543_v16 = vor.u32 %v541_v2, %v539_v1  ;;  %v549_v18 = vshrl.u32 %v5466_v62, 16  ;;  %v547_v20 = vrot.slane %v545_v9, 1  ;;  %v1025_v63 = vld [vmem:[%s5379_s23] sm:$0xe] }
  0x29   : > { %v468_v19 = vsel %vm424_vm1, %v463_v4, %v467_v8  ;;  %v473_v21 = vshll.u32 %v5476_v10, 16  ;;  %v553_v22 = vshll.u32 %v5479_v11, 16  ;;  %v477_v25 = vshrl.u32 %v5476_v10, 16 }
  0x2a   : > { %v548_v29 = vsel %vm424_vm1, %v543_v16, %v547_v20  ;;  %v471_v30 = vor.u32 %v469_v17, %v467_v8  ;;  %v481_v34 = vshll.u32 %v5488_v23, 16  ;;  %v557_v35 = vshrl.u32 %v5479_v11, 16 }
  0x2b   : > { %v475_v31 = vrot.slane %v473_v21, 1  ;;  %v555_v32 = vrot.slane %v553_v22, 1  ;;  %v561_v36 = vshll.u32 %v5493_v26, 16  ;;  %v551_v41 = vor.u32 %v549_v18, %v547_v20 }
  0x2c   : > { %4734 = vmatmul.mubr.msk.bf16.gmra.mxu1 %vm573_vm2, %v540_v12  ;;  %v483_v46 = vrot.slane %v481_v34, 1  ;;  %v489_v49 = vshll.u32 %v5502_v38, 16  ;;  %v485_v52 = vshrl.u32 %v5488_v23, 16  ;;  %v493_v54 = vshrl.u32 %v5502_v38, 16 }
  0x2d   : > { %4714 = vmatmul.mubr.msk.bf16.gmra.mxu0 %vm573_vm2, %v460_v3  ;;  %4737 = vmatprep.mubr.msk.bf16.mxu1 %vm573_vm2, %v548_v29  ;;  %v479_v42 = vor.u32 %v477_v25, %v475_v31  ;;  %v559_v47 = vor.u32 %v557_v35, %v555_v32  ;;  %v563_v48 = vrot.slane %v561_v36, 1  ;;  %v476_v51 = vsel %vm424_vm1, %v471_v30, %v475_v31 }
  0x2e   : > { %4717 = vmatprep.mubr.msk.bf16.mxu0 %vm573_vm2, %v468_v19  ;;  %v497_v55 = vshll.u32 %v5505_v40, 16  ;;  %v556_v56 = vsel %vm424_vm1, %v551_v41, %v555_v32  ;;  %v565_v57 = vshrl.u32 %v5493_v26, 16  ;;  %v569_v58 = vshll.u32 %v5158_v43, 16 }
  0x2f   : > { %v484_v53 = vsel %vm424_vm1, %v479_v42, %v483_v46  ;;  %v564_v59 = vsel %vm424_vm1, %v559_v47, %v563_v48  ;;  %v491_v60 = vrot.slane %v489_v49, 1  ;;  %v487_v61 = vor.u32 %v485_v52, %v483_v46  ;;  %v5604_v46 = vld [vmem:[%s5379_s23 + $0x10] sm:$0xff]   ;;  %v5609_v49 = vld [vmem:[%s5379_s23 + $0x18] sm:$0xff]  }
  0x30   : > { %v499_v1 = vrot.slane %v497_v55, 1  ;;  %v567_v2 = vor.u32 %v565_v57, %v563_v48  ;;  %v571_v3 = vrot.slane %v569_v58, 1  ;;  %v501_v8 = vshrl.u32 %v5505_v40, 16  ;;  %v5622_v55 = vld [vmem:[%s5379_s23 + $0x30] sm:$0xff]  }
  0x31   : > { %v495_v0 = vor.u32 %v493_v54, %v491_v60  ;;  %v492_v4 = vsel %vm424_vm1, %v487_v61, %v491_v60  ;;  %v4340_v12 = vcombine.low %v1025_v63, %v5383_v5  ;;  %v1065_v17 = vrot.slane %v5493_v26, 1  ;;  %v5637_v61 = vld [vmem:[%s5379_s23 + $0x38] sm:$0xff]  }
  0x32   : > { %v572_v16 = vsel %vm424_vm1, %v567_v2, %v571_v3  ;;  %v503_v18 = vor.u32 %v501_v8, %v499_v1  ;;  %v1067_v19 = vrot.slane %v5158_v43, 1  ;;  %v1033_v21 = vrot.slane %v5389_v7, 1  ;;  %v2225_v43 = vld [vmem:[%s5379_s23 + $0x8] sm:$0xc]  ;;  %v5647_v2 = vld [vmem:[%s5379_s23 + $0x40] sm:$0xff]  }
  0x33   : > { %v500_v9 = vsel %vm424_vm1, %v495_v0, %v499_v1  ;;  %v1032_v20 = vrot.slane %v4340_v12, 1  ;;  %v1563_v29 = vsel %vm628_vm0, %v5444_v45, 0  ;;  %v1035_v30 = vrot.slane %v5403_v15, 1  ;;  %v5655_v8 = vld [vmem:[%s5379_s23 + $0x48] sm:$0xff]  }
  0x34   : > { %4738 = vmatmul.mubr.msk.bf16.gmra.mxu1 %vm573_vm2, %v556_v56  ;;  %v5538_v5 = vsel %vm1031_vm3, %v1065_v17, %v1067_v19  ;;  %v508_v22 = vsel %vm424_vm1, %v503_v18, %v5414_v27  ;;  %v1037_v27 = vrot.slane %v5417_v28, 1  ;;  %v2010_v31 = vsel %vm628_vm0, %v5424_v33, 0 }
  0x35   : > { %4718 = vmatmul.mubr.msk.bf16.gmra.mxu0 %vm573_vm2, %v476_v51  ;;  %4741 = vmatprep.mubr.msk.bf16.mxu1 %vm573_vm2, %v564_v59  ;;  %v1034_v25 = vsel %vm1031_vm3, %v1032_v20, %v1033_v21  ;;  %v1036_v45 = vsel %vm1031_vm3, %v1033_v21, %v1035_v30  ;;  %v1041_v34 = vrot.slane %v5451_v50, 1  ;;  %v1045_v36 = vrot.slane %v5488_v23, 1  ;;  %v5613_v51 = vld [vmem:[%s5379_s23 + $0x20] sm:$0xff]  }
  0x36   : > { %4721 = vmatprep.mubr.msk.bf16.mxu0 %vm573_vm2, %v484_v53  ;;  %v1038_v32 = vsel %vm1031_vm3, %v1035_v30, %v1037_v27  ;;  %v1047_v42 = vrot.slane %v5502_v38, 1  ;;  %v2233_v53 = vrot.slane %v5604_v46, 2  ;;  %v2235_v54 = vrot.slane %v5609_v49, 2  ;;  %v5685_v30 = vld [vmem:[%s5379_s23 + $0x58] sm:$0xff]  }
  0x37   : > { %v2237_v57 = vrot.slane %v5613_v51, 2  ;;  %v1051_v58 = vrot.slane %v5397_v13, 1  ;;  %v1053_v59 = vrot.slane %v5400_v14, 1  ;;  %v2241_v1 = vrot.slane %v5622_v55, 2 }
  0x38   : > { %v1048_v48 = vsel %vm1031_vm3, %v1045_v36, %v1047_v42  ;;  %v5632_v60 = vsel %vm2231_vm4, %v2233_v53, %v2235_v54  ;;  %v2247_v18 = vrot.slane %v5655_v8, 2  ;;  %v1055_v20 = vrot.slane %v5412_v24, 1 }
  0x39   : > { %v5640_v63 = vsel %vm2231_vm4, %v2235_v54, %v2237_v57 }
  0x3c   : > { %4742 = vmatmul.mubr.msk.bf16.gmra.mxu1 %vm573_vm2, %v572_v16  ;;  %v2245_v16 = vrot.slane %v5647_v2, 2 }
  0x3d   : > { %4722 = vmatmul.mubr.msk.bf16.gmra.mxu0 %vm573_vm2, %v492_v4  ;;  %4747 = vmatprep.mubr.msk.bf16.mxu1 %vm573_vm2, %v5386_v6  ;;  %v5551_v6 = vld [vmem:[%s6984_s1 + $0x14] sm:$0xf]  ;;  %v2243_v4 = vrot.slane %v5637_v61, 2 }
  0x3e   : > { %4725 = vmatprep.mubr.msk.bf16.mxu0 %vm573_vm2, %v500_v9  ;;  %v5673_v21 = vsel %vm2231_vm4, %v2245_v16, %v2247_v18 }
  0x3f   : > { %v5662_v12 = vsel %vm2231_vm4, %v2241_v1, %v2243_v4  ;;  %v5668_v19 = vsel %vm2231_vm4, %v2243_v4, %v2245_v16 }
  0x44   : > { %4748 = vmatmul.mubr.msk.bf16.vlgmr.msra.gmra.mxu1 %vm573_vm2, %v5389_v7  ;;  %v5567_v7 = vld [vmem:[%s6984_s1 + $0x18] sm:$0xf] }
  0x45   : > { %4726 = vmatmul.mubr.msk.bf16.gmra.mxu0 %vm573_vm2, %v508_v22  ;;  %4822 = vmatpush3.bf16.msra.mxu1 %v1563_v29  ;;  %v1057_v22 = vrot.slane %v5430_v37, 1  ;;  %v1056_v29 = vsel %vm1031_vm3, %v1053_v59, %v1055_v20 }
  0x46   : > { %4785 = vmatprep.mubr.msk.bf16.mxu0 %vm573_vm2, %v1034_v25  ;;  %4751 = vmatprep.mubr.msk.bf16.mxu1 %vm573_vm2, %v5403_v15  ;;  %v1039_v15 = vrot.slane %v5434_v39, 1  ;;  %v5681_v25 = vld [vmem:[%s5379_s23 + $0x50] sm:$0xff]  }
  0x47   : > { %5092 = vmatprep.subr.msk.bf16.mxu1 %vm628_vm0, %v5551_v6 }
  0x48   : > { %v1040_v33 = vsel %vm1031_vm3, %v1037_v27, %v1039_v15  ;;  %v1042_v35 = vsel %vm1031_vm3, %v1039_v15, %v1041_v34  ;;  %v1058_v27 = vsel %vm1031_vm3, %v1055_v20, %v1057_v22  ;;  %v1061_v15 = vrot.slane %v5466_v62, 1 }
  0x4c   : > { %4752 = vmatmul.mubr.msk.bf16.gmra.mxu1 %vm573_vm2, %v5417_v28  ;;  %v1043_v28 = vrot.slane %v5476_v10, 1 }
  0x4d   : > { %4786 = vmatmul.mubr.msk.bf16.vlgmr.msra.gmra.mxu0 %vm573_vm2, %v1036_v45  ;;  %4755 = vmatprep.mubr.msk.bf16.mxu1 %vm573_vm2, %v5434_v39  ;;  %v2249_v45 = vrot.slane %v5681_v25, 2 }
  0x4e   : > { %4860 = vmatpush3.bf16.msra.mxu0 %v2010_v31  ;;  %4789 = vmatprep.mubr.msk.bf16.mxu0 %vm573_vm2, %v1038_v32  ;;  %v1044_v39 = vsel %vm1031_vm3, %v1041_v34, %v1043_v28  ;;  %v1046_v41 = vsel %vm1031_vm3, %v1043_v28, %v1045_v36  ;;  %v1339_v34 = vld [vmem:[%s5379_s23 + $0x8] sm:$0xe] }
  0x4f   : > { %5093 = vmatprep.subr.msk.bf16.mxu0 %vm628_vm0, %v5567_v7  ;;  %v5692_v31 = vsel %vm2231_vm4, %v2247_v18, %v2249_v45  ;;  %v5710_v28 = vld [vmem:[%s5379_s23 + $0x68] sm:$0xff]  }
  0x54   : > { %4756 = vmatmul.mubr.msk.bf16.gmra.mxu1 %vm573_vm2, %v5451_v50  ;;  %v1049_v50 = vrot.slane %v5505_v40, 1 }
  0x55   : > { %4790 = vmatmul.mubr.msk.bf16.gmra.mxu0 %vm573_vm2, %v1040_v33  ;;  %4759 = vmatprep.mubr.msk.bf16.mxu1 %vm573_vm2, %v5476_v10  ;;  %v5601_v10 = vld [vmem:[%s5379_s23 + $0xc] sm:$0xf]  ;;  %v5706_v33 = vld [vmem:[%s5379_s23 + $0x60] sm:$0xff]  }
  0x56   : > { %4793 = vmatprep.mubr.msk.bf16.mxu0 %vm573_vm2, %v1042_v35  ;;  %v4418_v47 = vcombine.low %v2225_v43, %v5601_v10 }
  0x58   : > { %v2232_v52 = vrot.slane %v4418_v47, 2  ;;  %v1794_v47 = vshrl.u32 %v5604_v46, 16 }
  0x5a   : > { %v5625_v56 = vsel %vm2231_vm4, %v2232_v52, %v2233_v53  ;;  %v1472_v52 = vrot.slane %v5604_v46, 1  ;;  %v5733_v53 = vld [vmem:[%s5379_s23 + $0x70] sm:$0xff]  }
  0x5b   : > { %v2257_v4 = vrot.slane %v5733_v53, 2 }
  0x5c   : > { %4760 = vmatmul.mubr.msk.bf16.gmra.mxu1 %vm573_vm2, %v5488_v23  ;;  %v1050_v23 = vsel %vm1031_vm3, %v1047_v42, %v1049_v50  ;;  %v1063_v42 = vrot.slane %v5479_v11, 1 }
  0x5d   : > { %4794 = vmatmul.mubr.msk.bf16.gmra.mxu0 %vm573_vm2, %v1044_v39  ;;  %4763 = vmatprep.mubr.msk.bf16.mxu1 %vm573_vm2, %v5502_v38  ;;  %v5617_v38 = vld [vmem:[%s5379_s23 + $0x28] sm:$0xff]   ;;  %v2253_v39 = vrot.slane %v5706_v33, 2 }
  0x5e   : > { %4797 = vmatprep.mubr.msk.bf16.mxu0 %vm573_vm2, %v1046_v41  ;;  %v2239_v0 = vrot.slane %v5617_v38, 2  ;;  %v4360_v41 = vcombine.low %v1339_v34, %v5601_v10  ;;  %v1064_v54 = vsel %vm1031_vm3, %v1061_v15, %v1063_v42  ;;  %v5766_v34 = vld [vmem:[%s5379_s23 + $0x88] sm:$0xff]  }
  0x60   : > { %v5650_v3 = vsel %vm2231_vm4, %v2237_v57, %v2239_v0  ;;  %v5658_v9 = vsel %vm2231_vm4, %v2239_v0, %v2241_v1  ;;  %v1786_v43 = vshrl.u32 %v4360_v41, 16  ;;  %v1789_v10 = vshll.u32 %v4360_v41, 16 }
  0x61   : > { %v1066_v57 = vsel %vm1031_vm3, %v1063_v42, %v1065_v17  ;;  %v1796_v0 = vrot.slane %v1794_v47, 1  ;;  %v1803_v17 = vshrl.u32 %v5609_v49, 16  ;;  %v1824_v47 = vshll.u32 %v5617_v38, 16 }
  0x64   : > { %4764 = vmatmul.mubr.msk.bf16.gmra.mxu1 %vm573_vm2, %v5505_v40  ;;  %v1052_v40 = vsel %vm1031_vm3, %v1049_v50, %v1051_v58 }
  0x65   : > { %4798 = vmatmul.mubr.msk.bf16.gmra.mxu0 %vm573_vm2, %v1048_v48  ;;  %4767 = vmatprep.mubr.msk.bf16.mxu1 %vm573_vm2, %v5397_v13  ;;  %v1054_v13 = vsel %vm1031_vm3, %v1051_v58, %v1053_v59  ;;  %v1797_v48 = vshll.u32 %v5604_v46, 16  ;;  %v5740_v58 = vld [vmem:[%s5379_s23 + $0x78] sm:$0xff]   ;;  %v1791_v59 = vrot.slane %v1789_v10, 2  ;;  %v1821_v10 = vshrl.u32 %v5617_v38, 16 }
  0x66   : > { %4801 = vmatprep.mubr.msk.bf16.mxu0 %vm573_vm2, %v1050_v23  ;;  %v1471_v23 = vrot.slane %v4360_v41, 1 }
  0x67   : > { %v1799_v1 = vrot.slane %v1797_v48, 2 }
  0x68   : > { %v1473_v46 = vsel %vm1031_vm3, %v1471_v23, %v1472_v52  ;;  %v1830_v23 = vshrl.u32 %v5622_v55, 16 }
  0x69   : > { %v1800_v20 = vor.u32 %v1799_v1, %v1796_v0  ;;  %v2763_v0 = vsel %vm628_vm0, %v5567_v7, 0  ;;  %v1823_v1 = vrot.slane %v1821_v10, 1 }
  0x6c   : > { %4768 = vmatmul.mubr.msk.bf16.gmra.mxu1 %vm573_vm2, %v5400_v14  ;;  %v2251_v14 = vrot.slane %v5685_v30, 2 }
  0x6d   : > { %4802 = vmatmul.mubr.msk.bf16.gmra.mxu0 %vm573_vm2, %v1052_v40  ;;  %4771 = vmatprep.mubr.msk.bf16.mxu1 %vm573_vm2, %v5412_v24  ;;  %v1059_v24 = vrot.slane %v5439_v44, 1 }
  0x6e   : > { %4805 = vmatprep.mubr.msk.bf16.mxu0 %vm573_vm2, %v1054_v13  ;;  %v5697_v32 = vsel %vm2231_vm4, %v2249_v45, %v2251_v14  ;;  %v1806_v13 = vshll.u32 %v5609_v49, 16  ;;  %v1476_v45 = vrot.slane %v5613_v51, 1 }
  0x6f   : > { %v1060_v35 = vsel %vm1031_vm3, %v1057_v22, %v1059_v24  ;;  %v1062_v36 = vsel %vm1031_vm3, %v1059_v24, %v1061_v15  ;;  %v1812_v22 = vshrl.u32 %v5613_v51, 16  ;;  %v1805_v24 = vrot.slane %v1803_v17, 1 }
  0x70   : > { %v1808_v15 = vrot.slane %v1806_v13, 2  ;;  %v1832_v17 = vrot.slane %v1830_v23, 1 }
  0x74   : > { %4772 = vmatmul.mubr.msk.bf16.gmra.mxu1 %vm573_vm2, %v5430_v37  ;;  %v2255_v37 = vrot.slane %v5710_v28, 2 }
  0x75   : > { %4806 = vmatmul.mubr.msk.bf16.gmra.mxu0 %vm573_vm2, %v1056_v29  ;;  %4775 = vmatprep.mubr.msk.bf16.mxu1 %vm573_vm2, %v5439_v44  ;;  %v5718_v44 = vsel %vm2231_vm4, %v2251_v14, %v2253_v39  ;;  %v1815_v29 = vshll.u32 %v5613_v51, 16  ;;  %v5763_v14 = vld [vmem:[%s5379_s23 + $0x80] sm:$0xff]  }
  0x76   : > { %4809 = vmatprep.mubr.msk.bf16.mxu0 %vm573_vm2, %v1058_v27  ;;  %v5723_v50 = vsel %vm2231_vm4, %v2253_v39, %v2255_v37  ;;  %v5747_v40 = vsel %vm2231_vm4, %v2255_v37, %v2257_v4  ;;  %v1474_v27 = vrot.slane %v5609_v49, 1  ;;  %v2261_v39 = vrot.slane %v5763_v14, 2 }
  0x77   : > { %v2263_v37 = vrot.slane %v5766_v34, 2  ;;  %v2324_v49 = vsel %vm628_vm0, %v5551_v6, 0 }
  0x78   : > { %v1475_v41 = vsel %vm1031_vm3, %v1472_v52, %v1474_v27  ;;  %v1477_v51 = vsel %vm1031_vm3, %v1474_v27, %v1476_v45  ;;  %v1833_v52 = vshll.u32 %v5622_v55, 16  ;;  %v1839_v27 = vshrl.u32 %v5637_v61, 16 }
  0x79   : > { %v5789_v6 = vsel %vm2231_vm4, %v2261_v39, %v2263_v37 }
  0x7c   : > { %4776 = vmatmul.mubr.msk.bf16.gmra.mxu1 %vm573_vm2, %v5466_v62  ;;  %v1788_v62 = vrot.slane %v1786_v43, 1  ;;  %v1809_v43 = vor.u32 %v1808_v15, %v1805_v24 }
  0x7d   : > { %4810 = vmatmul.mubr.msk.bf16.gmra.mxu0 %vm573_vm2, %v1060_v35  ;;  %4779 = vmatprep.mubr.msk.bf16.mxu1 %vm573_vm2, %v5479_v11  ;;  %v2259_v11 = vrot.slane %v5740_v58, 2  ;;  %v1814_v35 = vrot.slane %v1812_v22, 1 }
  0x7e   : > { %4813 = vmatprep.mubr.msk.bf16.mxu0 %vm573_vm2, %v1062_v36  ;;  %v1792_v18 = vor.u32 %v1791_v59, %v1788_v62  ;;  %v1817_v36 = vrot.slane %v1815_v29, 2  ;;  %v5798_v62 = vld [vmem:[%s5379_s23 + $0x90] sm:$0xff]   ;;  %v1810_v59 = vsel %vm1784_vm5, %v1800_v20, %v1809_v43 }
  0x7f   : > { %v5753_v16 = vsel %vm2231_vm4, %v2257_v4, %v2259_v11  ;;  %v5778_v42 = vsel %vm2231_vm4, %v2259_v11, %v2261_v39  ;;  %v1826_v4 = vrot.slane %v1824_v47, 2  ;;  %v5806_v11 = vld [vmem:[%s5379_s23 + $0x98] ss:$0 sps:$4 sm:$0x33]   ;;  %v1484_v39 = vrot.slane %v5647_v2, 1 }
  0x80   : > { %v1818_v48 = vor.u32 %v1817_v36, %v1814_v35  ;;  %v1851_v35 = vshll.u32 %v5647_v2, 16  ;;  %v1482_v36 = vrot.slane %v5637_v61, 1 }
  0x81   : > { %v1827_v29 = vor.u32 %v1826_v4, %v1823_v1  ;;  %v5851_v1 = vld [vmem:[%s5379_s23 + $0x14] sm:$0xf]  ;;  %v3425_v4 = vld [vmem:[%s5379_s23 + $0x10] sm:$0x8] }
  0x82   : > { %v1853_v10 = vrot.slane %v1851_v35, 2  ;;  %v1485_v23 = vsel %vm1031_vm3, %v1482_v36, %v1484_v39 }
  0x84   : > { %4780 = vmatmul.mubr.msk.bf16.gmra.mxu1 %vm573_vm2, %v5493_v26  ;;  %v1801_v26 = vsel %vm1784_vm5, %v1792_v18, %v1800_v20  ;;  %v5814_v18 = vld [vmem:[%s6984_s1 + $0x20] sm:$0xf]  ;;  %v2267_v20 = vrot.slane %v5806_v11, 2 }
  0x85   : > { %4814 = vmatmul.mubr.msk.bf16.gmra.mxu0 %vm573_vm2, %v1064_v54  ;;  %4823 = vmatprep.mubr.msk.bf16.mxu1 %vm573_vm2, %v1473_v46  ;;  %v1478_v54 = vrot.slane %v5617_v38, 1  ;;  %v1819_v46 = vsel %vm1784_vm5, %v1809_v43, %v1818_v48  ;;  %v1835_v38 = vrot.slane %v1833_v52, 2 }
  0x86   : > { %4817 = vmatprep.mubr.msk.bf16.mxu0 %vm573_vm2, %v1066_v57  ;;  %v1480_v57 = vrot.slane %v5622_v55, 1  ;;  %v2265_v55 = vrot.slane %v5798_v62, 2 }
  0x87   : > { %v1479_v13 = vsel %vm1031_vm3, %v1476_v45, %v1478_v54  ;;  %v1842_v45 = vshll.u32 %v5637_v61, 16  ;;  %v1836_v15 = vor.u32 %v1835_v38, %v1832_v17 }
  0x88   : > { %v1481_v7 = vsel %vm1031_vm3, %v1478_v54, %v1480_v57  ;;  %v5820_v22 = vsel %vm2231_vm4, %v2263_v37, %v2265_v55  ;;  %v5826_v24 = vsel %vm2231_vm4, %v2265_v55, %v2267_v20  ;;  %v1841_v37 = vrot.slane %v1839_v27, 1  ;;  %v5856_v55 = vld [vmem:[%s5379_s23 + $0x18] sm:$0xff]   ;;  %v5861_v27 = vld [vmem:[%s5379_s23 + $0x20] sm:$0xff]  }
  0x89   : > { %v1483_v47 = vsel %vm1031_vm3, %v1480_v57, %v1482_v36  ;;  %v1866_v54 = vshrl.u32 %v5681_v25, 16  ;;  %v1869_v57 = vshll.u32 %v5681_v25, 16  ;;  %v1875_v36 = vshrl.u32 %v5685_v30, 16 }
  0x8c   : > { %4824 = vmatmul.mubr.msk.bf16.vlgmr.msra.gmra.mxu1 %vm573_vm2, %v1475_v41  ;;  %v1828_v41 = vsel %vm1784_vm5, %v1818_v48, %v1827_v29  ;;  %v1860_v48 = vshll.u32 %v5655_v8, 16 }
  0x8d   : > { %4818 = vmatmul.mubr.msk.bf16.gmra.mxu0 %vm573_vm2, %v5538_v5  ;;  %v5786_v5 = vld [vmem:[%s6984_s1 + $0x1c] sm:$0xf]  ;;  %4898 = vmatpush3.bf16.msra.mxu1 %v2324_v49  ;;  %v1844_v49 = vrot.slane %v1842_v45, 2  ;;  %v3433_v45 = vrot.slane %v5856_v55, 3 }
  0x8e   : > { %4861 = vmatprep.mubr.msk.bf16.mxu0 %vm573_vm2, %v1801_v26  ;;  %4827 = vmatprep.mubr.msk.bf16.mxu1 %vm573_vm2, %v1477_v51  ;;  %v1848_v26 = vshrl.u32 %v5647_v2, 16  ;;  %v1837_v51 = vsel %vm1784_vm5, %v1827_v29, %v1836_v15  ;;  %v1857_v2 = vshrl.u32 %v5655_v8, 16  ;;  %v1862_v38 = vrot.slane %v1860_v48, 2 }
  0x8f   : > { %5094 = vmatprep.subr.msk.bf16.mxu1 %vm628_vm0, %v5786_v5  ;;  %v1845_v61 = vor.u32 %v1844_v49, %v1841_v37  ;;  %v1871_v29 = vrot.slane %v1869_v57, 2  ;;  %v1884_v49 = vshrl.u32 %v5706_v33, 16 }
  0x90   : > { %v1850_v43 = vrot.slane %v1848_v26, 1  ;;  %v1859_v17 = vrot.slane %v1857_v2, 1  ;;  %v6991_v26 = vrot.slane %v5861_v27, 3 }
  0x92   : > { %v1854_v52 = vor.u32 %v1853_v10, %v1850_v43  ;;  %v1863_v35 = vor.u32 %v1862_v38, %v1859_v17  ;;  %v5880_v43 = vsel %vm3431_vm6, %v3433_v45, %v6991_v26  ;;  %v1490_v10 = vrot.slane %v5685_v30, 1 }
  0x93   : > { %v1902_v17 = vshrl.u32 %v5733_v53, 16  ;;  %v1905_v38 = vshll.u32 %v5733_v53, 16 }
  0x94   : > { %4828 = vmatmul.mubr.msk.bf16.gmra.mxu1 %vm573_vm2, %v1479_v13  ;;  %v4496_v13 = vcombine.low %v3425_v4, %v5851_v1  ;;  %v1855_v20 = vsel %vm1784_vm5, %v1845_v61, %v1854_v52 }
  0x95   : > { %4862 = vmatmul.mubr.msk.bf16.vlgmr.msra.gmra.mxu0 %vm573_vm2, %v1810_v59  ;;  %4831 = vmatprep.mubr.msk.bf16.mxu1 %vm573_vm2, %v1481_v7  ;;  %v1486_v59 = vrot.slane %v5655_v8, 1  ;;  %v1868_v7 = vrot.slane %v1866_v54, 1  ;;  %v1886_v54 = vrot.slane %v1884_v49, 1  ;;  %v1911_v49 = vshrl.u32 %v5740_v58, 16 }
  0x96   : > { %4936 = vmatpush3.bf16.msra.mxu0 %v2763_v0  ;;  %4865 = vmatprep.mubr.msk.bf16.mxu0 %vm573_vm2, %v1819_v46  ;;  %v1488_v0 = vrot.slane %v5681_v25, 1  ;;  %v1846_v46 = vsel %vm1784_vm5, %v1836_v15, %v1845_v61  ;;  %v3432_v25 = vrot.slane %v4496_v13, 3  ;;  %v1877_v61 = vrot.slane %v1875_v36, 1 }
  0x97   : > { %5095 = vmatprep.subr.msk.bf16.mxu0 %vm628_vm0, %v5814_v18  ;;  %v1487_v8 = vsel %vm1031_vm3, %v1484_v39, %v1486_v59  ;;  %v1872_v39 = vor.u32 %v1871_v29, %v1868_v7  ;;  %v5265_v13 = vmov 0   ;;  %v1496_v7 = vrot.slane %v5733_v53, 1 }
  0x98   : > { %v1489_v15 = vsel %vm1031_vm3, %v1486_v59, %v1488_v0  ;;  %v5872_v37 = vsel %vm3431_vm6, %v3432_v25, %v3433_v45  ;;  %v1491_v59 = vsel %vm1031_vm3, %v1488_v0, %v1490_v10  ;;  %5139 = vset.pattern.permute.xlu0 %v5265_v13  ;;  %v1494_v0 = vrot.slane %v5710_v28, 1  ;;  %5140 = vset.pattern.permute.xlu1 %v5265_v13 }
  0x99   : > { %v1873_v48 = vsel %vm1784_vm5, %v1863_v35, %v1872_v39  ;;  %v1929_v13 = vshrl.u32 %v5766_v34, 16 }
  0x9a   : > { %v1497_v53 = vsel %vm1031_vm3, %v1494_v0, %v1496_v7 }
  0x9c   : > { %4832 = vmatmul.mubr.msk.bf16.gmra.mxu1 %vm573_vm2, %v1483_v47  ;;  %v1492_v47 = vrot.slane %v5706_v33, 1 }
  0x9d   : > { %4866 = vmatmul.mubr.msk.bf16.gmra.mxu0 %vm573_vm2, %v1828_v41  ;;  %4835 = vmatprep.mubr.msk.bf16.mxu1 %vm573_vm2, %v1485_v23  ;;  %v1878_v41 = vshll.u32 %v5685_v30, 16  ;;  %v1864_v23 = vsel %vm1784_vm5, %v1854_v52, %v1863_v35  ;;  %v1893_v30 = vshrl.u32 %v5710_v28, 16  ;;  %v1907_v35 = vrot.slane %v1905_v38, 2 }
  0x9e   : > { %4869 = vmatprep.mubr.msk.bf16.mxu0 %vm573_vm2, %v1837_v51  ;;  %v1887_v51 = vshll.u32 %v5706_v33, 16  ;;  %v1493_v4 = vsel %vm1031_vm3, %v1490_v10, %v1492_v47  ;;  %v1896_v33 = vshll.u32 %v5710_v28, 16  ;;  %v1495_v36 = vsel %vm1031_vm3, %v1492_v47, %v1494_v0  ;;  %v3820_v28 = vld [vmem:[%s6986_s3 + $0x10] sm:$0xff] }
  0x9f   : > { %v1880_v2 = vrot.slane %v1878_v41, 2  ;;  %v3819_v41 = vld [vmem:[%s6986_s3 + $0x8] sm:$0xff]  ;;  %3866 = vperm.xlu1 %5140, %v3820_v28   ;;  %v1920_v47 = vshrl.u32 %v5763_v14, 16  ;;  %v1932_v0 = vshll.u32 %v5766_v34, 16 }
  0xa0   : > { %v1889_v57 = vrot.slane %v1887_v51, 2  ;;  %v1898_v25 = vrot.slane %v1896_v33, 2  ;;  %v1914_v51 = vshll.u32 %v5740_v58, 16 }
  0xa1   : > { %v1934_v28 = vrot.slane %v1932_v0, 2  ;;  %v3834_v0 = vld [vmem:[%s6986_s3 + $0x80] sm:$0xff] }
  0xa2   : > { %v1890_v52 = vor.u32 %v1889_v57, %v1886_v54  ;;  %v1500_v54 = vrot.slane %v5763_v14, 1 }
  0xa4   : > { %4836 = vmatmul.mubr.msk.bf16.gmra.mxu1 %vm573_vm2, %v1487_v8  ;;  %v1895_v8 = vrot.slane %v1893_v30, 1  ;;  %v1922_v30 = vrot.slane %v1920_v47, 1 }
  0xa5   : > { %4870 = vmatmul.mubr.msk.bf16.gmra.mxu0 %vm573_vm2, %v1846_v46  ;;  %4839 = vmatprep.mubr.msk.bf16.mxu1 %vm573_vm2, %v1489_v15  ;;  %v1881_v46 = vor.u32 %v1880_v2, %v1877_v61  ;;  %v1904_v15 = vrot.slane %v1902_v17, 1  ;;  %v1498_v61 = vrot.slane %v5740_v58, 1  ;;  %v3821_v2 = vld [vmem:[%s6986_s3 + $0x18] sm:$0xff]  ;;  %v3823_v17 = vld [vmem:[%s6986_s3 + $0x28] sm:$0xff] }
  0xa6   : > { %4873 = vmatprep.mubr.msk.bf16.mxu0 %vm573_vm2, %v1855_v20  ;;  %v3818_v20 = vld [vmem:[%s6986_s3] sm:$0xff]  ;;  %3871 = vperm.xlu1 %5140, %v3821_v2  }
  0xa7   : > { %3856 = vperm.xlu0 %5139, %v3818_v20   ;;  %v1882_v29 = vsel %vm1784_vm5, %v1872_v39, %v1881_v46  ;;  %v1891_v45 = vsel %vm1784_vm5, %v1881_v46, %v1890_v52  ;;  %v1899_v39 = vor.u32 %v1898_v25, %v1895_v8  ;;  %v1908_v10 = vor.u32 %v1907_v35, %v1904_v15  ;;  %v3825_v25 = vld [vmem:[%s6986_s3 + $0x38] sm:$0xff] }
  0xa8   : > { %v1499_v33 = vsel %vm1031_vm3, %v1496_v7, %v1498_v61  ;;  %v1938_v7 = vshrl.u32 %v5798_v62, 16  ;;  %v1502_v8 = vrot.slane %v5766_v34, 1  ;;  %v1504_v15 = vrot.slane %v5798_v62, 1 }
  0xa9   : > { %v1900_v57 = vsel %vm1784_vm5, %v1890_v52, %v1899_v39  ;;  %v1909_v46 = vsel %vm1784_vm5, %v1899_v39, %v1908_v10  ;;  %v1501_v52 = vsel %vm1031_vm3, %v1498_v61, %v1500_v54  ;;  %v1950_v61 = vshll.u32 %v5806_v11, 16 }
  0xaa   : > { %3881 = vperm.xlu1 %5140, %v3823_v17   ;;  %v1503_v39 = vsel %vm1031_vm3, %v1500_v54, %v1502_v8  ;;  %v2539_v54 = vld [vmem:[%s5379_s23 + $0x10] sm:$0xc]  ;;  %v3831_v17 = vld [vmem:[%s6986_s3 + $0x68] sm:$0xff] }
  0xab   : > { %3861 = vperm.xlu0 %5139, %v3819_v41  }
  0xac   : > { %4840 = vmatmul.mubr.msk.bf16.gmra.mxu1 %vm573_vm2, %v1491_v59  ;;  %v1913_v59 = vrot.slane %v1911_v49, 1  ;;  %v5179_v49 = vld [vmem:[%s5379_s23 + $0x98] ss:$0 sps:$4 sm:$0x11]  }
  0xad   : > { %4874 = vmatmul.mubr.msk.bf16.gmra.mxu0 %vm573_vm2, %v1864_v23  ;;  %4843 = vmatprep.mubr.msk.bf16.mxu1 %vm573_vm2, %v1493_v4  ;;  %v1923_v23 = vshll.u32 %v5763_v14, 16  ;;  %v1916_v4 = vrot.slane %v1914_v51, 2  ;;  %v3824_v14 = vld [vmem:[%s6986_s3 + $0x30] sm:$0xff]  ;;  %v3827_v51 = vld [vmem:[%s6986_s3 + $0x48] sm:$0xff] }
  0xae   : > { %4877 = vmatprep.mubr.msk.bf16.mxu0 %vm573_vm2, %v1873_v48  ;;  %v3822_v48 = vld [vmem:[%s6986_s3 + $0x20] sm:$0xff]  ;;  %3891 = vperm.xlu1 %5140, %v3825_v25   ;;  %v3210_v25 = vsel %vm628_vm0, %v5786_v5, 0  ;;  %v3837_v5 = vld [vmem:[%s6986_s3 + $0x98] sm:$0xff] }
  0xaf   : > { %3876 = vperm.xlu0 %5139, %v3822_v48   ;;  %v1925_v58 = vrot.slane %v1923_v23, 2  ;;  %v1917_v38 = vor.u32 %v1916_v4, %v1913_v59  ;;  %v1947_v23 = vshrl.u32 %v5806_v11, 16  ;;  %v1506_v48 = vrot.slane %v5179_v49, 1  ;;  %v3830_v59 = vld [vmem:[%s6986_s3 + $0x60] sm:$0xff]  ;;  %v3841_v49 = vld [vmem:[%s6986_s3 + $0xb8] sm:$0xff] }
  0xb1   : > { %v1926_v20 = vor.u32 %v1925_v58, %v1922_v30  ;;  %v1918_v35 = vsel %vm1784_vm5, %v1908_v10, %v1917_v38  ;;  %v1505_v10 = vsel %vm1031_vm3, %v1502_v8, %v1504_v15  ;;  %v1949_v11 = vrot.slane %v1947_v23, 1  ;;  %v3836_v8 = vld [vmem:[%s6986_s3 + $0x90] sm:$0xff] }
  0xb2   : > { %3901 = vperm.xlu1 %5140, %v3827_v51   ;;  %v5981_v58 = vcombine.low %v2539_v54, %v5851_v1  ;;  %v3842_v51 = vld [vmem:[%s6986_s3 + $0xc0] sm:$0xff]  ;;  %v3844_v23 = vld [vmem:[%s6986_s3 + $0xd0] sm:$0xff] }
  0xb3   : > { %3886 = vperm.xlu0 %5139, %v3824_v14   ;;  %v1927_v41 = vsel %vm1784_vm5, %v1917_v38, %v1926_v20  ;;  %v3832_v14 = vld [vmem:[%s6986_s3 + $0x70] sm:$0xff]  ;;  %v2672_v38 = vrot.slane %v5856_v55, 2 }
  0xb4   : > { %4844 = vmatmul.mubr.msk.bf16.gmra.mxu1 %vm573_vm2, %v1495_v36  ;;  %v1931_v36 = vrot.slane %v1929_v13, 1  ;;  %v2671_v1 = vrot.slane %v5981_v58, 2  ;;  %v3833_v13 = vld [vmem:[%s6986_s3 + $0x78] sm:$0xff] }
  0xb5   : > { %4878 = vmatmul.mubr.msk.bf16.gmra.mxu0 %vm573_vm2, %v1882_v29  ;;  %4847 = vmatprep.mubr.msk.bf16.mxu1 %vm573_vm2, %v1497_v53  ;;  %v1941_v29 = vshll.u32 %v5798_v62, 16  ;;  %v1940_v53 = vrot.slane %v1938_v7, 1  ;;  %v3828_v62 = vld [vmem:[%s6986_s3 + $0x50] sm:$0xff] }
  0xb6   : > { %4881 = vmatprep.mubr.msk.bf16.mxu0 %vm573_vm2, %v1891_v45  ;;  %v3826_v45 = vld [vmem:[%s6986_s3 + $0x40] sm:$0xff]  ;;  %v1935_v47 = vor.u32 %v1934_v28, %v1931_v36  ;;  %v2673_v7 = vsel %vm2231_vm4, %v2671_v1, %v2672_v38  ;;  %v6032_v28 = vld [vmem:[%s5379_s23 + $0x30] sm:$0xff]  }
  0xb7   : > { %3896 = vperm.xlu0 %5139, %v3826_v45   ;;  %v1943_v34 = vrot.slane %v1941_v29, 2  ;;  %v6006_v29 = vld [vmem:[%s5379_s23 + $0x28] sm:$0xff]   ;;  %v2674_v45 = vrot.slane %v5861_v27, 2  ;;  %v3848_v1 = vld [vmem:[%s6986_s3 + $0xf0] sm:$0xff] }
  0xb8   : > { %v1936_v4 = vsel %vm1784_vm5, %v1926_v20, %v1935_v47 }
  0xb9   : > { %v1944_v2 = vor.u32 %v1943_v34, %v1940_v53  ;;  %v2675_v36 = vsel %vm2231_vm4, %v2672_v38, %v2674_v45  ;;  %v3839_v53 = vld [vmem:[%s6986_s3 + $0xa8] sm:$0xff]  ;;  %v3840_v34 = vld [vmem:[%s6986_s3 + $0xb0] sm:$0xff] }
  0xbb   : > { %3906 = vperm.xlu0 %5139, %v3828_v62   ;;  %v1945_v30 = vsel %vm1784_vm5, %v1935_v47, %v1944_v2  ;;  %v6066_v47 = vld [vmem:[%s5379_s23 + $0x48] sm:$0xff]  }
  0xbc   : > { %4848 = vmatmul.mubr.msk.bf16.gmra.mxu1 %vm573_vm2, %v1499_v33  ;;  %v1507_v33 = vsel %vm1031_vm3, %v1504_v15, %v1506_v48  ;;  %v2676_v15 = vrot.slane %v6006_v29, 2 }
  0xbd   : > { %4882 = vmatmul.mubr.msk.bf16.gmra.mxu0 %vm573_vm2, %v1900_v57  ;;  %4851 = vmatprep.mubr.msk.bf16.mxu1 %vm573_vm2, %v1501_v52  ;;  %v3829_v57 = vld [vmem:[%s6986_s3 + $0x58] sm:$0xff] }
  0xbe   : > { %4885 = vmatprep.mubr.msk.bf16.mxu0 %vm573_vm2, %v1909_v46  ;;  %3911 = vperm.xlu1 %5140, %v3829_v57   ;;  %v1952_v46 = vrot.slane %v1950_v61, 2  ;;  %v2684_v57 = vrot.slane %v6066_v47, 2 }
  0xbf   : > { %3916 = vperm.xlu0 %5139, %v3830_v59   ;;  %v3845_v59 = vld [vmem:[%s6986_s3 + $0xd8] sm:$0xff] }
  0xc0   : > { %v1953_v52 = vor.u32 %v1952_v46, %v1949_v11 }
  0xc2   : > { %3921 = vperm.xlu1 %5140, %v3831_v17   ;;  %v1954_v20 = vsel %vm1784_vm5, %v1944_v2, %v1953_v52  ;;  %v3847_v52 = vld [vmem:[%s6986_s3 + $0xe8] sm:$0xff] }
  0xc3   : > { %3926 = vperm.xlu0 %5139, %v3832_v14   ;;  %v6108_v14 = vld [vmem:[%s5379_s23 + $0x58] sm:$0xff]  }
  0xc4   : > { %4852 = vmatmul.mubr.msk.bf16.gmra.mxu1 %vm573_vm2, %v1503_v39 }
  0xc5   : > { %4886 = vmatmul.mubr.msk.bf16.gmra.mxu0 %vm573_vm2, %v1918_v35  ;;  %4855 = vmatprep.mubr.msk.bf16.mxu1 %vm573_vm2, %v1505_v10  ;;  %v3838_v35 = vld [vmem:[%s6986_s3 + $0xa0] sm:$0xff] }
  0xc6   : > { %4889 = vmatprep.mubr.msk.bf16.mxu0 %vm573_vm2, %v1927_v41  ;;  %3931 = vperm.xlu1 %5140, %v3833_v13   ;;  %v2677_v41 = vsel %vm2231_vm4, %v2674_v45, %v2676_v15  ;;  %v6062_v10 = vld [vmem:[%s5379_s23 + $0x40] sm:$0xff]  }
  0xc7   : > { %3936 = vperm.xlu0 %5139, %v3834_v0   ;;  %v2682_v2 = vrot.slane %v6062_v10, 2 }
  0xc9   : > { %v2685_v17 = vsel %vm2231_vm4, %v2682_v2, %v2684_v57 }
  0xcb   : > { %3946 = vperm.xlu0 %5139, %v3836_v8   ;;  %v3849_v8 = vld [vmem:[%s6986_s3 + $0xf8] sm:$0xff] }
  0xcc   : > { %4856 = vmatmul.mubr.msk.bf16.gmra.mxu1 %vm573_vm2, %v1507_v33 }
  0xcd   : > { %4890 = vmatmul.mubr.msk.bf16.gmra.mxu0 %vm573_vm2, %v1936_v4  ;;  %4899 = vmatprep.mubr.msk.bf16.mxu1 %vm573_vm2, %v5625_v56  ;;  %v3835_v56 = vld [vmem:[%s6986_s3 + $0x88] sm:$0xff]  ;;  %v3846_v4 = vld [vmem:[%s6986_s3 + $0xe0] sm:$0xff] }
  0xce   : > { %4893 = vmatprep.mubr.msk.bf16.mxu0 %vm573_vm2, %v1945_v30  ;;  %3941 = vperm.xlu1 %5140, %v3835_v56   ;;  %v6100_v30 = vld [vmem:[%s5379_s23 + $0x50] sm:$0xff]   ;;  %v2688_v56 = vrot.slane %v6108_v14, 2 }
  0xcf   : > { %3956 = vperm.xlu0 %5139, %v3838_v35   ;;  %v2686_v0 = vrot.slane %v6100_v30, 2 }
  0xd2   : > { %3951 = vperm.xlu1 %5140, %v3837_v5   ;;  %v6144_v5 = vld [vmem:[%s5379_s23 + $0x60] sm:$0xff]  }
  0xd3   : > { %3966 = vperm.xlu0 %5139, %v3840_v34  }
  0xd4   : > { %4900 = vmatmul.mubr.msk.bf16.vlgmr.msra.gmra.mxu1 %vm573_vm2, %v5632_v60  ;;  %v3524_v60 = vsel %vm628_vm0, %v5814_v18, 0  ;;  %v2678_v18 = vrot.slane %v6032_v28, 2 }
  0xd5   : > { %4894 = vmatmul.mubr.msk.bf16.gmra.mxu0 %vm573_vm2, %v1954_v20  ;;  %4974 = vmatpush3.bf16.msra.mxu1 %v3210_v25  ;;  %v3850_v25 = vld [vmem:[%s6986_s3 + $0x100] sm:$0xff] }
  0xd6   : > { %4937 = vmatprep.mubr.msk.bf16.mxu0 %vm573_vm2, %v2673_v7  ;;  %4903 = vmatprep.mubr.msk.bf16.mxu1 %vm573_vm2, %v5640_v63  ;;  %v6038_v63 = vld [vmem:[%s5379_s23 + $0x38] sm:$0xff]   ;;  %v2679_v62 = vsel %vm2231_vm4, %v2676_v15, %v2678_v18 }
  0xd7   : > { %3961 = vperm.xlu1 %5140, %v3839_v53   ;;  %v2680_v39 = vrot.slane %v6038_v63, 2  ;;  %3976 = vperm.xlu0 %5139, %v3842_v51   ;;  %v3852_v53 = vld [vmem:[%s6986_s3 + $0x110] sm:$0xff] }
  0xdb   : > { %3971 = vperm.xlu1 %5140, %v3841_v49   ;;  %3986 = vperm.xlu0 %5139, %v3844_v23  }
  0xdc   : > { %4904 = vmatmul.mubr.msk.bf16.gmra.mxu1 %vm573_vm2, %v5650_v3  ;;  %v2681_v3 = vsel %vm2231_vm4, %v2678_v18, %v2680_v39 }
  0xdd   : > { %4938 = vmatmul.mubr.msk.bf16.vlgmr.msra.gmra.mxu0 %vm573_vm2, %v2675_v36  ;;  %4907 = vmatprep.mubr.msk.bf16.mxu1 %vm573_vm2, %v5658_v9  ;;  %v3843_v9 = vld [vmem:[%s6986_s3 + $0xc8] sm:$0xff]  ;;  %v2689_v36 = vsel %vm2231_vm4, %v2686_v0, %v2688_v56 }
  0xde   : > { %5012 = vmatpush3.bf16.msra.mxu0 %v3524_v60  ;;  %4941 = vmatprep.mubr.msk.bf16.mxu0 %vm573_vm2, %v2677_v41  ;;  %v6152_v60 = vld [vmem:[%s5379_s23 + $0x68] sm:$0xff]  }
  0xdf   : > { %3981 = vperm.xlu1 %5140, %v3843_v9   ;;  %3996 = vperm.xlu0 %5139, %v3846_v4   ;;  %v3851_v41 = vld [vmem:[%s6986_s3 + $0x108] sm:$0xff]  ;;  %v6193_v4 = vld [vmem:[%s5379_s23 + $0x78] sm:$0xff]  }
  0xe3   : > { %3991 = vperm.xlu1 %5140, %v3845_v59   ;;  %4006 = vperm.xlu0 %5139, %v3848_v1  }
  0xe4   : > { %v6079_v48 = vpop.f32.mrf.mxu1  ;;  %4908 = vmatmul.mubr.msk.bf16.gmra.mxu1 %vm573_vm2, %v5662_v12  ;;  %v2683_v12 = vsel %vm2231_vm4, %v2680_v39, %v2682_v2  ;;  %v2690_v39 = vrot.slane %v6144_v5, 2 }
  0xe5   : > { %v6074_v61 = vpop.f32.mrf.mxu0  ;;  %4942 = vmatmul.mubr.msk.bf16.gmra.mxu0 %vm573_vm2, %v2679_v62  ;;  %4911 = vmatprep.mubr.msk.bf16.mxu1 %vm573_vm2, %v5668_v19  ;;  %v2692_v62 = vrot.slane %v6152_v60, 2 }
  0xe6   : > { %4945 = vmatprep.mubr.msk.bf16.mxu0 %vm573_vm2, %v2681_v3  ;;  %v6094_v11 = vpop.f32.mrf.mxu1  ;;  %v3853_v3 = vld [vmem:[%s6986_s3 + $0x118] sm:$0xff]  ;;  %v2691_v2 = vsel %vm2231_vm4, %v2688_v56, %v2690_v39  ;;  %v2696_v56 = vrot.slane %v6193_v4, 2 }
  0xe7   : > { %v6083_v54 = vpop.f32.mrf.mxu0  ;;  %4001 = vperm.xlu1 %5140, %v3847_v52   ;;  %4016 = vperm.xlu0 %5139, %v3850_v25  }
  0xe8   : > { %v6102_v33 = vpop.f32.mrf.mxu1 }
  0xe9   : > { %v6096_v46 = vpop.f32.mrf.mxu0 }
  0xea   : > { %v6116_v38 = vpop.f32.mrf.mxu1 }
  0xeb   : > { %v6104_v19 = vpop.f32.mrf.mxu0  ;;  %4011 = vperm.xlu1 %5140, %v3849_v8   ;;  %4026 = vperm.xlu0 %5139, %v3852_v53  }
  0xec   : > { %v6123_v20 = vpop.f32.mrf.mxu1  ;;  %4912 = vmatmul.mubr.msk.bf16.gmra.mxu1 %vm573_vm2, %v5673_v21  ;;  %v2687_v21 = vsel %vm2231_vm4, %v2684_v57, %v2686_v0 }
  0xed   : > { %v6118_v13 = vpop.f32.mrf.mxu0  ;;  %4946 = vmatmul.mubr.msk.bf16.gmra.mxu0 %vm573_vm2, %v2683_v12  ;;  %4915 = vmatprep.mubr.msk.bf16.mxu1 %vm573_vm2, %v5692_v31 }
  0xee   : > { %4949 = vmatprep.mubr.msk.bf16.mxu0 %vm573_vm2, %v2685_v17  ;;  %v6138_v45 = vpop.f32.mrf.mxu1 }
  0xef   : > { %v6127_v7 = vpop.f32.mrf.mxu0  ;;  %4021 = vperm.xlu1 %5140, %v3851_v41  }
  0xf0   : > { %v6146_v35 = vpop.f32.mrf.mxu1 }
  0xf1   : > { %v6140_v15 = vpop.f32.mrf.mxu0  ;;  %7000 = vst [vmem:[#allocation5_spill] sm:$0xff] %v6146_v35 }
  0xf2   : > { %v6160_v34 = vpop.f32.mrf.mxu1 }
  0xf3   : > { %v6148_v31 = vpop.f32.mrf.mxu0  ;;  %7001 = vst [vmem:[#allocation6_spill] sm:$0xff] %v6160_v34  ;;  %4031 = vperm.xlu1 %5140, %v3853_v3  }
  0xf4   : > { %v6167_v49 = vpop.f32.mrf.mxu1  ;;  %4916 = vmatmul.mubr.msk.bf16.gmra.mxu1 %vm573_vm2, %v5697_v32  ;;  %v6185_v32 = vld [vmem:[%s5379_s23 + $0x70] sm:$0xff]  }
  0xf5   : > { %v6162_v18 = vpop.f32.mrf.mxu0  ;;  %4950 = vmatmul.mubr.msk.bf16.gmra.mxu0 %vm573_vm2, %v2687_v21  ;;  %7002 = vst [vmem:[#allocation7_spill] sm:$0xff] %v6167_v49  ;;  %4919 = vmatprep.mubr.msk.bf16.mxu1 %vm573_vm2, %v5718_v44  ;;  %v2693_v44 = vsel %vm2231_vm4, %v2690_v39, %v2692_v62  ;;  %v2694_v52 = vrot.slane %v6185_v32, 2  ;;  %v6225_v39 = vld [vmem:[%s5379_s23 + $0x88] sm:$0xff]  }
  0xf6   : > { %4953 = vmatprep.mubr.msk.bf16.mxu0 %vm573_vm2, %v2689_v36  ;;  %v6179_v9 = vpop.f32.mrf.mxu1  ;;  %v6217_v36 = vld [vmem:[%s5379_s23 + $0x80] sm:$0xff]   ;;  %7010 = vst [vmem:[#allocation15_spill] sm:$0xff] %v6225_v39 }
  0xf7   : > { %v6171_v51 = vpop.f32.mrf.mxu0  ;;  %7003 = vst [vmem:[#allocation8_spill] sm:$0xff] %v6179_v9  ;;  %v2695_v21 = vsel %vm2231_vm4, %v2692_v62, %v2694_v52  ;;  %7008 = vst [vmem:[#allocation13_spill] sm:$0xff] %v6217_v36  ;;  %v6257_v9 = vld [vmem:[%s5379_s23 + $0x98] sm:$0xff]  }
  0xf8   : > { %v6187_v57 = vpop.f32.mrf.mxu1  ;;  %7012 = vst [vmem:[#allocation17_spill] sm:$0xff] %v6257_v9 }
  0xf9   : > { %v6181_v23 = vpop.f32.mrf.mxu0  ;;  %7004 = vst [vmem:[#allocation9_spill] sm:$0xff] %v6187_v57  ;;  %v6251_v57 = vld [vmem:[%s5379_s23 + $0x90] sm:$0xff]  }
  0xfa   : > { %v6195_v12 = vpop.f32.mrf.mxu1 }
  0xfb   : > { %v6189_v59 = vpop.f32.mrf.mxu0  ;;  %7005 = vst [vmem:[#allocation10_spill] sm:$0xff] %v6195_v12 }
  0xfc   : > { %v6202_v1 = vpop.f32.mrf.mxu1  ;;  %4920 = vmatmul.mubr.msk.bf16.gmra.mxu1 %vm573_vm2, %v5723_v50  ;;  %v2697_v50 = vsel %vm2231_vm4, %v2694_v52, %v2696_v56  ;;  %v2700_v52 = vrot.slane %v6225_v39, 2 }
  0xfd   : > { %v6197_v17 = vpop.f32.mrf.mxu0  ;;  %4954 = vmatmul.mubr.msk.bf16.gmra.mxu0 %vm573_vm2, %v2691_v2  ;;  %7006 = vst [vmem:[#allocation11_spill] sm:$0xff] %v6202_v1  ;;  %4923 = vmatprep.mubr.msk.bf16.mxu1 %vm573_vm2, %v5747_v40  ;;  %v2698_v40 = vrot.slane %v6217_v36, 2 }
  0xfe   : > { %4957 = vmatprep.mubr.msk.bf16.mxu0 %vm573_vm2, %v2693_v44  ;;  %v6211_v8 = vpop.f32.mrf.mxu1 }
  0xff   : > { %v6206_v0 = vpop.f32.mrf.mxu0  ;;  %7007 = vst [vmem:[#allocation12_spill] sm:$0xff] %v6211_v8  ;;  %v2699_v12 = vsel %vm2231_vm4, %v2696_v56, %v2698_v40 }
 0x100   : > { %v6219_v41 = vpop.f32.mrf.mxu1 }
 0x101   : > { %v6213_v25 = vpop.f32.mrf.mxu0  ;;  %7009 = vst [vmem:[#allocation14_spill] sm:$0xff] %v6219_v41  ;;  %v2994_v41 = vshrl.u32 %v5856_v55, 16 }
 0x102   : > { %v6227_v3 = vpop.f32.mrf.mxu1 }
 0x103   : > { %v6221_v53 = vpop.f32.mrf.mxu0  ;;  %7011 = vst [vmem:[#allocation16_spill] sm:$0xff] %v6227_v3  ;;  %v2989_v3 = vshll.u32 %v5981_v58, 16 }
 0x104   : > { %v4749_v62 = vpop.f32.mrf.mxu1  ;;  %4924 = vmatmul.mubr.msk.bf16.gmra.mxu1 %vm573_vm2, %v5753_v16  ;;  %v2997_v16 = vshll.u32 %v5856_v55, 16 }
 0x105   : > { %v6229_v2 = vpop.f32.mrf.mxu0  ;;  %4958 = vmatmul.mubr.msk.bf16.gmra.mxu0 %vm573_vm2, %v2695_v21  ;;  %v891_v26 = vadd.f32 %v4749_v62, %v6074_v61  ;;  %4927 = vmatprep.mubr.msk.bf16.mxu1 %vm573_vm2, %v5778_v42  ;;  %v2701_v42 = vsel %vm2231_vm4, %v2698_v40, %v2700_v52  ;;  %v2991_v39 = vrot.slane %v2989_v3, 3  ;;  %v2702_v40 = vrot.slane %v6251_v57, 2 }
 0x106   : > { %4961 = vmatprep.mubr.msk.bf16.mxu0 %vm573_vm2, %v2697_v50  ;;  %v882_v21 = vpop.f32.mrf.mxu1  ;;  %v2986_v50 = vshrl.u32 %v5981_v58, 16 }
 0x107   : > { %v6236_v44 = vpop.f32.mrf.mxu0  ;;  %v883_v1 = vadd.f32 %v882_v21, %v6083_v54  ;;  %v2996_v54 = vrot.slane %v2994_v41, 2  ;;  %v2999_v21 = vrot.slane %v2997_v16, 3 }
 0x108   : > { %v4750_v61 = vpop.f32.mrf.mxu1  ;;  %v2988_v55 = vrot.slane %v2986_v50, 2 }
 0x109   : > { %v6242_v8 = vpop.f32.mrf.mxu0  ;;  %v894_v49 = vadd.f32 %v4750_v61, %v6096_v46  ;;  %v2704_v61 = vrot.slane %v6257_v9, 2  ;;  %v3000_v16 = vor.u32 %v2999_v21, %v2996_v54 }
 0x10a   : > { %v885_v58 = vpop.f32.mrf.mxu1  ;;  %v2992_v50 = vor.u32 %v2991_v39, %v2988_v55 }
 0x10b   : > { %v6253_v62 = vpop.f32.mrf.mxu0  ;;  %v886_v56 = vadd.f32 %v885_v58, %v6104_v19  ;;  %v3006_v19 = vshll.u32 %v5861_v27, 16 }
 0x10c   : > { %v4753_v35 = vpop.f32.mrf.mxu1  ;;  %4928 = vmatmul.mubr.msk.bf16.gmra.mxu1 %vm573_vm2, %v5789_v6  ;;  %v3012_v6 = vshrl.u32 %v6006_v29, 16 }
 0x10d   : > { %v4787_v34 = vpop.f32.mrf.mxu0  ;;  %4962 = vmatmul.mubr.msk.bf16.gmra.mxu0 %vm573_vm2, %v2699_v12  ;;  %v907_v12 = vadd.f32 %v4753_v35, %v6118_v13  ;;  %4931 = vmatprep.mubr.msk.bf16.mxu1 %vm573_vm2, %v5820_v22  ;;  %v2703_v35 = vsel %vm2231_vm4, %v2700_v52, %v2702_v40  ;;  %v5200_v22 = vld [vmem:[%s5379_s23 + $0xa0] ss:$0 sps:$4 sm:$0x33]   ;;  %v3008_v54 = vrot.slane %v3006_v19, 3  ;;  %v3024_v19 = vshll.u32 %v6032_v28, 16 }
 0x10e   : > { %v6262_v36 = vadd.f32 %v4787_v34, %v891_v26  ;;  %4965 = vmatprep.mubr.msk.bf16.mxu0 %vm573_vm2, %v2701_v42  ;;  %v3003_v26 = vshrl.u32 %v5861_v27, 16  ;;  %v898_v34 = vpop.f32.mrf.mxu1  ;;  %v3015_v42 = vshll.u32 %v6006_v29, 16 }
 0x10f   : > { %v1160_v46 = vpop.f32.mrf.mxu0  ;;  %v899_v58 = vadd.f32 %v898_v34, %v6127_v7  ;;  %v3001_v7 = vsel %vm2984_vm7, %v2992_v50, %v3000_v16 }
 0x110   : > { %7013 = vst [vmem:[#allocation18_spill] sm:$0xff] %v6262_v36  ;;  %v6270_v41 = vadd.f32 %v1160_v46, %v883_v1  ;;  %v4754_v1 = vpop.f32.mrf.mxu1  ;;  %v3005_v55 = vrot.slane %v3003_v26, 2  ;;  %v3017_v52 = vrot.slane %v3015_v42, 3  ;;  %v3021_v26 = vshrl.u32 %v6032_v28, 16 }
 0x111   : > { %v4788_v3 = vpop.f32.mrf.mxu0  ;;  %v910_v36 = vadd.f32 %v4754_v1, %v6140_v15  ;;  %v3030_v42 = vshrl.u32 %v6038_v63, 16 }
 0x112   : > { %7014 = vst [vmem:[#allocation19_spill] sm:$0xff] %v6270_v41  ;;  %v6279_v13 = vadd.f32 %v4788_v3, %v894_v49  ;;  %v2705_v41 = vsel %vm2231_vm4, %v2702_v40, %v2704_v61  ;;  %v901_v21 = vpop.f32.mrf.mxu1  ;;  %v3014_v49 = vrot.slane %v3012_v6, 2  ;;  %v2706_v40 = vrot.slane %v5200_v22, 2 }
 0x113   : > { %v1163_v46 = vpop.f32.mrf.mxu0  ;;  %v902_v34 = vadd.f32 %v901_v21, %v6148_v31  ;;  %v3009_v31 = vor.u32 %v3008_v54, %v3005_v55  ;;  %v3026_v21 = vrot.slane %v3024_v19, 3 }
 0x114   : > { %v6285_v39 = vadd.f32 %v1163_v46, %v886_v56  ;;  %v4757_v15 = vpop.f32.mrf.mxu1  ;;  %4932 = vmatmul.mubr.msk.bf16.gmra.mxu1 %vm573_vm2, %v5826_v24  ;;  %v2707_v1 = vsel %vm2231_vm4, %v2704_v61, %v2706_v40 }
 0x115   : > { %v4791_v9 = vpop.f32.mrf.mxu0  ;;  %4966 = vmatmul.mubr.msk.bf16.gmra.mxu0 %vm573_vm2, %v2703_v35  ;;  %v923_v50 = vadd.f32 %v4757_v15, %v6162_v18  ;;  %4975 = vmatprep.mubr.msk.bf16.mxu1 %vm573_vm2, %v3001_v7  ;;  %v3033_v35 = vshll.u32 %v6038_v63, 16  ;;  %v3010_v54 = vsel %vm2984_vm7, %v3000_v16, %v3009_v31 }
 0x116   : > { %v6290_v3 = vadd.f32 %v4791_v9, %v907_v12  ;;  %4969 = vmatprep.mubr.msk.bf16.mxu0 %vm573_vm2, %v2705_v41  ;;  %v914_v9 = vpop.f32.mrf.mxu1  ;;  %v3018_v41 = vor.u32 %v3017_v52, %v3014_v49 }
 0x117   : > { %v1176_v56 = vpop.f32.mrf.mxu0  ;;  %v915_v24 = vadd.f32 %v914_v9, %v6171_v51  ;;  %v3035_v15 = vrot.slane %v3033_v35, 3 }
 0x118   : > { %v6298_v6 = vadd.f32 %v1176_v56, %v899_v58  ;;  %v4758_v46 = vpop.f32.mrf.mxu1  ;;  %v3023_v58 = vrot.slane %v3021_v26, 2  ;;  %v3019_v51 = vsel %vm2984_vm7, %v3009_v31, %v3018_v41  ;;  %v3437_v56 = vrot.slane %v6006_v29, 3 }
 0x119   : > { %v4792_v12 = vpop.f32.mrf.mxu0  ;;  %v926_v7 = vadd.f32 %v4758_v46, %v6181_v23  ;;  %v7015_v46 = vrot.slane %v5861_v27, 3 }
 0x11a   : > { %v6304_v22 = vadd.f32 %v4792_v12, %v910_v36  ;;  %v917_v49 = vpop.f32.mrf.mxu1  ;;  %v3032_v36 = vrot.slane %v3030_v42, 2  ;;  %v3027_v16 = vor.u32 %v3026_v21, %v3023_v58  ;;  %v3048_v12 = vshrl.u32 %v6066_v47, 16 }
 0x11b   : > { %v1179_v18 = vpop.f32.mrf.mxu0  ;;  %v918_v61 = vadd.f32 %v917_v49, %v6189_v59  ;;  %v3039_v59 = vshrl.u32 %v6062_v10, 16  ;;  %v3051_v42 = vshll.u32 %v6066_v47, 16 }
 0x11c   : > { %v6308_v55 = vadd.f32 %v1179_v18, %v902_v34  ;;  %v4761_v23 = vpop.f32.mrf.mxu1  ;;  %4976 = vmatmul.mubr.msk.bf16.vlgmr.msra.gmra.mxu1 %vm573_vm2, %v3010_v54  ;;  %v3438_v18 = vsel %vm3431_vm6, %v7015_v46, %v3437_v56 }
 0x11d   : > { %v4795_v52 = vpop.f32.mrf.mxu0  ;;  %4970 = vmatmul.mubr.msk.bf16.gmra.mxu0 %vm573_vm2, %v2707_v1  ;;  %v939_v26 = vadd.f32 %v4761_v23, %v6197_v17  ;;  %4979 = vmatprep.mubr.msk.bf16.mxu1 %vm573_vm2, %v3019_v51  ;;  %v3028_v1 = vsel %vm2984_vm7, %v3018_v41, %v3027_v16  ;;  %v3041_v54 = vrot.slane %v3039_v59, 2  ;;  %v3441_v23 = vrot.slane %v6038_v63, 3 }
 0x11e   : > { %v6314_v40 = vadd.f32 %v4795_v52, %v923_v50  ;;  %5013 = vmatprep.mubr.msk.bf16.mxu0 %vm573_vm2, %v5872_v37  ;;  %v3042_v50 = vshll.u32 %v6062_v10, 16  ;;  %v930_v31 = vpop.f32.mrf.mxu1  ;;  %v3036_v37 = vor.u32 %v3035_v15, %v3032_v36  ;;  %v3053_v36 = vrot.slane %v3051_v42, 3 }
 0x11f   : > { %v1192_v34 = vpop.f32.mrf.mxu0  ;;  %v931_v35 = vadd.f32 %v930_v31, %v6206_v0  ;;  %v3066_v31 = vshrl.u32 %v6108_v14, 16 }
 0x120   : > { %v6321_v19 = vadd.f32 %v1192_v34, %v915_v24  ;;  %v4762_v17 = vpop.f32.mrf.mxu1  ;;  %v3044_v49 = vrot.slane %v3042_v50, 3  ;;  %v3037_v0 = vsel %vm2984_vm7, %v3027_v16, %v3036_v37  ;;  %v3060_v34 = vshll.u32 %v6100_v30, 16 }
 0x121   : > { %v4796_v9 = vpop.f32.mrf.mxu0  ;;  %v942_v58 = vadd.f32 %v4762_v17, %v6213_v25  ;;  %v3439_v25 = vrot.slane %v6032_v28, 3 }
 0x122   : > { %v6329_v29 = vadd.f32 %v4796_v9, %v926_v7  ;;  %v933_v52 = vpop.f32.mrf.mxu1  ;;  %v3050_v7 = vrot.slane %v3048_v12, 2  ;;  %v3069_v9 = vshll.u32 %v6108_v14, 16 }
 0x123   : > { %v1195_v24 = vpop.f32.mrf.mxu0  ;;  %v934_v41 = vadd.f32 %v933_v52, %v6221_v53  ;;  %v3045_v53 = vor.u32 %v3044_v49, %v3041_v54  ;;  %v3440_v42 = vsel %vm3431_vm6, %v3437_v56, %v3439_v25 }
 0x124   : > { %v6336_v21 = vadd.f32 %v1195_v24, %v918_v61  ;;  %v4765_v15 = vpop.f32.mrf.mxu1  ;;  %4980 = vmatmul.mubr.msk.bf16.gmra.mxu1 %vm573_vm2, %v3028_v1  ;;  %v3054_v28 = vor.u32 %v3053_v36, %v3050_v7  ;;  %v3062_v1 = vrot.slane %v3060_v34, 3  ;;  %v3071_v56 = vrot.slane %v3069_v9, 3 }
 0x125   : > { %v4799_v51 = vpop.f32.mrf.mxu0  ;;  %5014 = vmatmul.mubr.msk.bf16.vlgmr.msra.gmra.mxu0 %vm573_vm2, %v5880_v43  ;;  %v3057_v43 = vshrl.u32 %v6100_v30, 16  ;;  %v955_v16 = vadd.f32 %v4765_v15, %v6229_v2  ;;  %4983 = vmatprep.mubr.msk.bf16.mxu1 %vm573_vm2, %v3037_v0  ;;  %v3046_v54 = vsel %vm2984_vm7, %v3036_v37, %v3045_v53  ;;  %v3075_v15 = vshrl.u32 %v6144_v5, 16 }
 0x126   : > { %v6342_v27 = vadd.f32 %v4799_v51, %v939_v26  ;;  %5017 = vmatprep.mubr.msk.bf16.mxu0 %vm573_vm2, %v3438_v18  ;;  %v946_v26 = vpop.f32.mrf.mxu1 }
 0x127   : > { %v1208_v61 = vpop.f32.mrf.mxu0  ;;  %v947_v63 = vadd.f32 %v946_v26, %v6236_v44  ;;  %v3059_v24 = vrot.slane %v3057_v43, 2  ;;  %v3055_v44 = vsel %vm2984_vm7, %v3045_v53, %v3054_v28 }
 0x128   : > { %v6351_v59 = vadd.f32 %v1208_v61, %v931_v35  ;;  %v4766_v17 = vpop.f32.mrf.mxu1  ;;  %v3442_v35 = vsel %vm3431_vm6, %v3439_v25, %v3441_v23 }
 0x129   : > { %v4800_v50 = vpop.f32.mrf.mxu0  ;;  %v958_v46 = vadd.f32 %v4766_v17, %v6242_v8  ;;  %v3443_v8 = vrot.slane %v6062_v10, 3  ;;  %v3063_v36 = vor.u32 %v3062_v1, %v3059_v24  ;;  %v3084_v10 = vshrl.u32 %v6152_v60, 16 }
 0x12a   : > { %v6357_v12 = vadd.f32 %v4800_v50, %v942_v58  ;;  %v949_v49 = vpop.f32.mrf.mxu1  ;;  %v3068_v58 = vrot.slane %v3066_v31, 2  ;;  %v3077_v17 = vrot.slane %v3075_v15, 2  ;;  %v3105_v15 = vshll.u32 %v6193_v4, 16 }
 0x12b   : > { %v1211_v2 = vpop.f32.mrf.mxu0  ;;  %v950_v51 = vadd.f32 %v949_v49, %v6253_v62  ;;  %v3078_v62 = vshll.u32 %v6144_v5, 16  ;;  %v3444_v26 = vsel %vm3431_vm6, %v3441_v23, %v3443_v8  ;;  %v3064_v31 = vsel %vm2984_vm7, %v3054_v28, %v3063_v36 }
 0x12c   : > { %v6362_v18 = vadd.f32 %v1211_v2, %v934_v41  ;;  %v4769_v7 = vpop.f32.mrf.mxu1  ;;  %4984 = vmatmul.mubr.msk.bf16.gmra.mxu1 %vm573_vm2, %v3046_v54  ;;  %v3445_v41 = vrot.slane %v6066_v47, 3  ;;  %v3072_v34 = vor.u32 %v3071_v56, %v3068_v58  ;;  %v3093_v58 = vshrl.u32 %v6185_v32, 16 }
 0x12d   : > { %v4803_v52 = vpop.f32.mrf.mxu0  ;;  %5018 = vmatmul.mubr.msk.bf16.gmra.mxu0 %vm573_vm2, %v3440_v42  ;;  %4987 = vmatprep.mubr.msk.bf16.mxu1 %vm573_vm2, %v3055_v44  ;;  %v3080_v2 = vrot.slane %v3078_v62, 3  ;;  %v3449_v44 = vrot.slane %v6108_v14, 3  ;;  %v3096_v56 = vshll.u32 %v6185_v32, 16 }
 0x12e   : > { %v6368_v0 = vadd.f32 %v4803_v52, %v955_v16  ;;  %5021 = vmatprep.mubr.msk.bf16.mxu0 %vm573_vm2, %v3442_v35  ;;  %v962_v61 = vpop.f32.mrf.mxu1  ;;  %v3087_v16 = vshll.u32 %v6152_v60, 16  ;;  %v3446_v9 = vsel %vm3431_vm6, %v3443_v8, %v3445_v41  ;;  %v3073_v1 = vsel %vm2984_vm7, %v3063_v36, %v3072_v34 }
 0x12f   : > { %v1224_v37 = vpop.f32.mrf.mxu0  ;;  %v963_v54 = vadd.f32 %v962_v61, %v6094_v11  ;;  %v3081_v11 = vor.u32 %v3080_v2, %v3077_v17  ;;  %v3102_v36 = vshrl.u32 %v6193_v4, 16 }
 0x130   : > { %v6374_v25 = vadd.f32 %v1224_v37, %v947_v63  ;;  %v4770_v47 = vpop.f32.mrf.mxu1  ;;  %v971_v63 = vadd.f32 %v4769_v7, %v6079_v48  ;;  %v3089_v23 = vrot.slane %v3087_v16, 3  ;;  %v3447_v48 = vrot.slane %v6100_v30, 3 }
 0x131   : > { %v4804_v43 = vpop.f32.mrf.mxu0  ;;  %v3095_v16 = vrot.slane %v3093_v58, 2  ;;  %v3104_v17 = vrot.slane %v3102_v36, 2 }
 0x132   : > { %v6381_v53 = vadd.f32 %v4804_v43, %v958_v46  ;;  %v965_v35 = vpop.f32.mrf.mxu1  ;;  %v3086_v46 = vrot.slane %v3084_v10, 2  ;;  %v3448_v61 = vsel %vm3431_vm6, %v3445_v41, %v3447_v48  ;;  %v3450_v10 = vsel %vm3431_vm6, %v3447_v48, %v3449_v44 }
 0x133   : > { %v1227_v50 = vpop.f32.mrf.mxu0  ;;  %v966_v14 = vadd.f32 %v965_v35, %v6116_v38  ;;  %v3107_v41 = vrot.slane %v3105_v15, 3 }
 0x134   : > { %v6387_v42 = vadd.f32 %v1227_v50, %v950_v51  ;;  %v4773_v28 = vpop.f32.mrf.mxu1  ;;  %4988 = vmatmul.mubr.msk.bf16.gmra.mxu1 %vm573_vm2, %v3064_v31  ;;  %v974_v51 = vadd.f32 %v4770_v47, %v6102_v33  ;;  %v3090_v30 = vor.u32 %v3089_v23, %v3086_v46  ;;  %v3082_v31 = vsel %vm2984_vm7, %v3072_v34, %v3081_v11  ;;  %v7016_v23 = vld [vmem:[#allocation5_spill] sm:$0xff] }
 0x135   : > { %v4807_v24 = vpop.f32.mrf.mxu0  ;;  %5022 = vmatmul.mubr.msk.bf16.gmra.mxu0 %vm573_vm2, %v3444_v26  ;;  %4991 = vmatprep.mubr.msk.bf16.mxu1 %vm573_vm2, %v3073_v1  ;;  %v3098_v26 = vrot.slane %v3096_v56, 3  ;;  %v987_v47 = vadd.f32 %v4773_v28, %v6123_v20  ;;  %v3451_v20 = vrot.slane %v6144_v5, 3  ;;  %v3453_v46 = vrot.slane %v6152_v60, 3 }
 0x136   : > { %v6392_v49 = vadd.f32 %v4807_v24, %v971_v63  ;;  %5025 = vmatprep.mubr.msk.bf16.mxu0 %vm573_vm2, %v3446_v9  ;;  %v978_v7 = vpop.f32.mrf.mxu1  ;;  %v3091_v38 = vsel %vm2984_vm7, %v3081_v11, %v3090_v30  ;;  %v3108_v5 = vor.u32 %v3107_v41, %v3104_v17  ;;  %v7021_v41 = vld [vmem:[#allocation8_spill] sm:$0xff] }
 0x137   : > { %v1240_v52 = vpop.f32.mrf.mxu0  ;;  %v979_v2 = vadd.f32 %v978_v7, %v6138_v45  ;;  %v3099_v1 = vor.u32 %v3098_v26, %v3095_v16  ;;  %v7017_v45 = vld [vmem:[#allocation13_spill] sm:$0xff]  ;;  %v3452_v15 = vsel %vm3431_vm6, %v3449_v44, %v3451_v20 }
 0x138   : > { %v6401_v8 = vadd.f32 %v1240_v52, %v963_v54  ;;  %v4774_v43 = vpop.f32.mrf.mxu1  ;;  %v3111_v28 = vshrl.u32 %v7017_v45, 16  ;;  %v3114_v52 = vshll.u32 %v7017_v45, 16 }
 0x139   : > { %v4808_v37 = vpop.f32.mrf.mxu0  ;;  %v990_v54 = vadd.f32 %v4774_v43, %v7016_v23  ;;  %v3100_v43 = vsel %vm2984_vm7, %v3090_v30, %v3099_v1  ;;  %v3455_v30 = vrot.slane %v6185_v32, 3  ;;  %v3457_v23 = vrot.slane %v6193_v4, 3 }
 0x13a   : > { %v6407_v62 = vadd.f32 %v4808_v37, %v974_v51  ;;  %v981_v9 = vpop.f32.mrf.mxu1  ;;  %v7018_v51 = vld [vmem:[#allocation15_spill] sm:$0xff]  ;;  %v7019_v37 = vld [vmem:[#allocation6_spill] sm:$0xff] }
 0x13b   : > { %v1243_v33 = vpop.f32.mrf.mxu0  ;;  %v3120_v11 = vshrl.u32 %v7018_v51, 16  ;;  %v3123_v7 = vshll.u32 %v7018_v51, 16  ;;  %v982_v36 = vadd.f32 %v981_v9, %v7019_v37  ;;  %v3109_v9 = vsel %vm2984_vm7, %v3099_v1, %v3108_v5  ;;  %v7023_v37 = vld [vmem:[#allocation17_spill] sm:$0xff] }
 0x13c   : > { %v6412_v50 = vadd.f32 %v1243_v33, %v966_v14  ;;  %v4777_v24 = vpop.f32.mrf.mxu1  ;;  %4992 = vmatmul.mubr.msk.bf16.gmra.mxu1 %vm573_vm2, %v3082_v31  ;;  %v3454_v33 = vsel %vm3431_vm6, %v3451_v20, %v3453_v46  ;;  %v3116_v31 = vrot.slane %v3114_v52, 3  ;;  %v3132_v1 = vshll.u32 %v6251_v57, 16 }
 0x13d   : > { %v4811_v63 = vpop.f32.mrf.mxu0  ;;  %5026 = vmatmul.mubr.msk.bf16.gmra.mxu0 %vm573_vm2, %v3448_v61  ;;  %4995 = vmatprep.mubr.msk.bf16.mxu1 %vm573_vm2, %v3091_v38  ;;  %v3122_v17 = vrot.slane %v3120_v11, 2  ;;  %v3125_v44 = vrot.slane %v3123_v7, 3  ;;  %v3141_v4 = vshll.u32 %v7023_v37, 16 }
 0x13e   : > { %v6418_v35 = vadd.f32 %v4811_v63, %v987_v47  ;;  %5029 = vmatprep.mubr.msk.bf16.mxu0 %vm573_vm2, %v3450_v10  ;;  %v994_v58 = vpop.f32.mrf.mxu1  ;;  %v7020_v10 = vld [vmem:[#allocation7_spill] sm:$0xff]  ;;  %v3113_v47 = vrot.slane %v3111_v28, 2  ;;  %v7022_v28 = vld [vmem:[#allocation9_spill] sm:$0xff] }
 0x13f   : > { %v1256_v34 = vpop.f32.mrf.mxu0  ;;  %v1003_v16 = vadd.f32 %v4777_v24, %v7020_v10  ;;  %v3126_v7 = vor.u32 %v3125_v44, %v3122_v17  ;;  %v6470_v44 = vld [vmem:[%s5379_s23 + $0xa0] ss:$0 sps:$4 sm:$0x77]  }
 0x140   : > { %v6425_v48 = vadd.f32 %v1256_v34, %v979_v2  ;;  %v4778_v14 = vpop.f32.mrf.mxu1  ;;  %v995_v2 = vadd.f32 %v994_v58, %v7021_v41  ;;  %v3117_v58 = vor.u32 %v3116_v31, %v3113_v47  ;;  %v3134_v31 = vrot.slane %v3132_v1, 3 }
 0x141   : > { %v4812_v56 = vpop.f32.mrf.mxu0  ;;  %v1006_v52 = vadd.f32 %v4778_v14, %v7022_v28  ;;  %v3456_v14 = vsel %vm3431_vm6, %v3453_v46, %v3455_v30  ;;  %v3143_v28 = vrot.slane %v3141_v4, 3  ;;  %v3461_v1 = vrot.slane %v7018_v51, 3 }
 0x142   : > { %v6433_v60 = vadd.f32 %v4812_v56, %v990_v54  ;;  %v997_v63 = vpop.f32.mrf.mxu1  ;;  %v3129_v54 = vshrl.u32 %v6251_v57, 16  ;;  %v3118_v17 = vsel %vm2984_vm7, %v3108_v5, %v3117_v58  ;;  %v3127_v46 = vsel %vm2984_vm7, %v3117_v58, %v3126_v7 }
 0x143   : > { %v1259_v61 = vpop.f32.mrf.mxu0  ;;  %v3150_v4 = vshll.u32 %v6470_v44, 16 }
 0x144   : > { %v6439_v26 = vadd.f32 %v1259_v61, %v982_v36  ;;  %v4781_v20 = vpop.f32.mrf.mxu1  ;;  %4996 = vmatmul.mubr.msk.bf16.gmra.mxu1 %vm573_vm2, %v3100_v43  ;;  %v3138_v36 = vshrl.u32 %v7023_v37, 16  ;;  %v3131_v47 = vrot.slane %v3129_v54, 2 }
 0x145   : > { %v4815_v38 = vpop.f32.mrf.mxu0  ;;  %5030 = vmatmul.mubr.msk.bf16.gmra.mxu0 %vm573_vm2, %v3452_v15  ;;  %4999 = vmatprep.mubr.msk.bf16.mxu1 %vm573_vm2, %v3109_v9  ;;  %v7024_v15 = vld [vmem:[#allocation10_spill] sm:$0xff] }
 0x146   : > { %v6444_v34 = vadd.f32 %v4815_v38, %v1003_v16  ;;  %5033 = vmatprep.mubr.msk.bf16.mxu0 %vm573_vm2, %v3454_v33  ;;  %v6456_v11 = vpop.f32.mrf.mxu1  ;;  %v998_v61 = vadd.f32 %v997_v63, %v7024_v15  ;;  %v3458_v16 = vsel %vm3431_vm6, %v3455_v30, %v3457_v23  ;;  %v7025_v38 = vld [vmem:[#allocation11_spill] sm:$0xff]  ;;  %v3459_v30 = vrot.slane %v7017_v45, 3 }
 0x147   : > { %v1272_v24 = vpop.f32.mrf.mxu0  ;;  %v1019_v9 = vadd.f32 %v4781_v20, %v7025_v38  ;;  %v3135_v54 = vor.u32 %v3134_v31, %v3131_v47 }
 0x148   : > { %v6453_v56 = vadd.f32 %v1272_v24, %v995_v2  ;;  %v4782_v33 = vpop.f32.mrf.mxu1  ;;  %v3140_v24 = vrot.slane %v3138_v36, 2  ;;  %v3147_v36 = vshrl.u32 %v6470_v44, 16  ;;  %v3460_v51 = vsel %vm3431_vm6, %v3457_v23, %v3459_v30 }
 0x149   : > { %v4816_v32 = vpop.f32.mrf.mxu0 }
 0x14a   : > { %v6461_v43 = vadd.f32 %v4816_v32, %v1006_v52  ;;  %v1013_v2 = vpop.f32.mrf.mxu1  ;;  %v7026_v32 = vld [vmem:[#allocation14_spill] sm:$0xff] }
 0x14b   : > { %v1275_v10 = vpop.f32.mrf.mxu0  ;;  %v1022_v15 = vadd.f32 %v4782_v33, %v7026_v32 }
 0x14c   : > { %v6466_v41 = vadd.f32 %v1275_v10, %v998_v61  ;;  %v4825_v20 = vpop.f32.mrf.mxu1  ;;  %5000 = vmatmul.mubr.msk.bf16.gmra.mxu1 %vm573_vm2, %v3118_v17  ;;  %v7027_v61 = vld [vmem:[#allocation18_spill] sm:$0xff]  ;;  %v3144_v10 = vor.u32 %v3143_v28, %v3140_v24  ;;  %v3152_v24 = vrot.slane %v3150_v4, 3 }
 0x14d   : > { %v4819_v63 = vpop.f32.mrf.mxu0  ;;  %5034 = vmatmul.mubr.msk.bf16.gmra.mxu0 %vm573_vm2, %v3456_v14  ;;  %v1744_v58 = vadd.f32 %v4825_v20, %v7027_v61  ;;  %5003 = vmatprep.mubr.msk.bf16.mxu1 %vm573_vm2, %v3127_v46  ;;  %v3462_v46 = vsel %vm3431_vm6, %v3459_v30, %v3461_v1  ;;  %v3149_v61 = vrot.slane %v3147_v36, 2  ;;  %v3465_v36 = vrot.slane %v7023_v37, 3 }
 0x14e   : > { %v6474_v52 = vadd.f32 %v4819_v63, %v1019_v9  ;;  %5037 = vmatprep.mubr.msk.bf16.mxu0 %vm573_vm2, %v3458_v16  ;;  %v1599_v14 = vpop.f32.mrf.mxu1  ;;  %v7028_v16 = vld [vmem:[#allocation16_spill] sm:$0xff]  ;;  %v7029_v9 = vld [vmem:[#allocation19_spill] sm:$0xff]  ;;  %v3136_v63 = vsel %vm2984_vm7, %v3126_v7, %v3135_v54  ;;  %v3463_v7 = vrot.slane %v6251_v57, 3 }
 0x14f   : > { %v6479_v5 = vpop.f32.mrf.mxu0  ;;  %v1014_v38 = vadd.f32 %v1013_v2, %v7028_v16  ;;  %v1742_v17 = vadd.f32 %v1599_v14, %v7029_v9 }
 0x150   : > { %v4826_v33 = vpop.f32.mrf.mxu1  ;;  %v3464_v57 = vsel %vm3431_vm6, %v3461_v1, %v3463_v7  ;;  %v3467_v1 = vrot.slane %v6470_v44, 3 }
 0x151   : > { %v4820_v45 = vpop.f32.mrf.mxu0  ;;  %v1745_v20 = vadd.f32 %v4826_v33, %v6279_v13  ;;  %v3466_v33 = vsel %vm3431_vm6, %v3463_v7, %v3465_v36 }
 0x152   : > { %v6489_v47 = vadd.f32 %v4820_v45, %v1022_v15  ;;  %v1602_v28 = vpop.f32.mrf.mxu1  ;;  %v3145_v15 = vsel %vm2984_vm7, %v3135_v54, %v3144_v10  ;;  %v3153_v54 = vor.u32 %v3152_v24, %v3149_v61 }
 0x153   : > { %v1291_v31 = vpop.f32.mrf.mxu0  ;;  %v1743_v23 = vadd.f32 %v1602_v28, %v6285_v39 }
 0x154   : > { %v6495_v32 = vadd.f32 %v1291_v31, %v1014_v38  ;;  %v4829_v30 = vpop.f32.mrf.mxu1  ;;  %5004 = vmatmul.mubr.msk.bf16.gmra.mxu1 %vm573_vm2, %v3136_v63 }
 0x155   : > { %v4863_v2 = vpop.f32.mrf.mxu0  ;;  %5038 = vmatmul.mubr.msk.bf16.gmra.mxu0 %vm573_vm2, %v3460_v51  ;;  %v1748_v4 = vadd.f32 %v4829_v30, %v6290_v3  ;;  %5007 = vmatprep.mubr.msk.bf16.mxu1 %vm573_vm2, %v3145_v15 }
 0x156   : > { %v6500_v14 = vadd.f32 %v4863_v2, %v1744_v58  ;;  %5041 = vmatprep.mubr.msk.bf16.mxu0 %vm573_vm2, %v3462_v46  ;;  %v1615_v39 = vpop.f32.mrf.mxu1 }
 0x157   : > { %v2046_v13 = vpop.f32.mrf.mxu0  ;;  %v1746_v16 = vadd.f32 %v1615_v39, %v6298_v6 }
 0x158   : > { %v6507_v45 = vadd.f32 %v2046_v13, %v1742_v17  ;;  %v4830_v9 = vpop.f32.mrf.mxu1  ;;  %v3154_v17 = vsel %vm2984_vm7, %v3144_v10, %v3153_v54 }
 0x159   : > { %v4864_v58 = vpop.f32.mrf.mxu0  ;;  %v1749_v37 = vadd.f32 %v4830_v9, %v6304_v22 }
 0x15a   : > { %v6511_v38 = vadd.f32 %v4864_v58, %v1745_v20  ;;  %v1618_v31 = vpop.f32.mrf.mxu1 }
 0x15b   : > { %v2049_v51 = vpop.f32.mrf.mxu0  ;;  %v1747_v6 = vadd.f32 %v1618_v31, %v6308_v55  ;;  %v3468_v55 = vsel %vm3431_vm6, %v3465_v36, %v3467_v1 }
 0x15c   : > { %v6516_v3 = vadd.f32 %v2049_v51, %v1743_v23  ;;  %v4833_v20 = vpop.f32.mrf.mxu1  ;;  %5008 = vmatmul.mubr.msk.bf16.gmra.mxu1 %vm573_vm2, %v3154_v17 }
 0x15d   : > { %v4867_v63 = vpop.f32.mrf.mxu0  ;;  %5042 = vmatmul.mubr.msk.bf16.gmra.mxu0 %vm573_vm2, %v3464_v57  ;;  %v1752_v61 = vadd.f32 %v4833_v20, %v6314_v40 }
 0x15e   : > { %v6521_v46 = vadd.f32 %v4867_v63, %v1748_v4  ;;  %5045 = vmatprep.mubr.msk.bf16.mxu0 %vm573_vm2, %v3466_v33  ;;  %v1631_v10 = vpop.f32.mrf.mxu1 }
 0x15f   : > { %v2062_v22 = vpop.f32.mrf.mxu0  ;;  %v1750_v2 = vadd.f32 %v1631_v10, %v6321_v19 }
 0x160   : > { %v6527_v24 = vadd.f32 %v2062_v22, %v1746_v16  ;;  %v4834_v23 = vpop.f32.mrf.mxu1 }
 0x161   : > { %v4868_v28 = vpop.f32.mrf.mxu0  ;;  %v1753_v44 = vadd.f32 %v4834_v23, %v6329_v29 }
 0x162   : > { %v6530_v15 = vadd.f32 %v4868_v28, %v1749_v37  ;;  %v1634_v13 = vpop.f32.mrf.mxu1 }
 0x163   : > { %v2065_v7 = vpop.f32.mrf.mxu0  ;;  %v1751_v40 = vadd.f32 %v1634_v13, %v6336_v21 }
 0x164   : > { %v6534_v30 = vadd.f32 %v2065_v7, %v1747_v6  ;;  %v4837_v39 = vpop.f32.mrf.mxu1 }
 0x165   : > { %v4871_v4 = vpop.f32.mrf.mxu0  ;;  %5046 = vmatmul.mubr.msk.bf16.gmra.mxu0 %vm573_vm2, %v3468_v55  ;;  %v1756_v58 = vadd.f32 %v4837_v39, %v6342_v27 }
 0x166   : > { %v6538_v54 = vadd.f32 %v4871_v4, %v1752_v61  ;;  %v1647_v36 = vpop.f32.mrf.mxu1 }
 0x167   : > { %v2078_v19 = vpop.f32.mrf.mxu0  ;;  %v1754_v29 = vadd.f32 %v1647_v36, %v6351_v59 }
 0x168   : > { %v6541_v16 = vadd.f32 %v2078_v19, %v1750_v2  ;;  %v4838_v51 = vpop.f32.mrf.mxu1 }
 0x169   : > { %v4872_v57 = vpop.f32.mrf.mxu0  ;;  %v1757_v37 = vadd.f32 %v4838_v51, %v6357_v12 }
 0x16a   : > { %v6544_v9 = vadd.f32 %v4872_v57, %v1753_v44  ;;  %v1650_v21 = vpop.f32.mrf.mxu1 }
 0x16b   : > { %v2081_v33 = vpop.f32.mrf.mxu0  ;;  %v1755_v63 = vadd.f32 %v1650_v21, %v6362_v18 }
 0x16c   : > { %v6547_v17 = vadd.f32 %v2081_v33, %v1751_v40  ;;  %v4841_v27 = vpop.f32.mrf.mxu1 }
 0x16d   : > { %v4875_v31 = vpop.f32.mrf.mxu0  ;;  %v1760_v20 = vadd.f32 %v4841_v27, %v6368_v0 }
 0x16e   : > { %v6550_v6 = vadd.f32 %v4875_v31, %v1756_v58  ;;  %v1663_v59 = vpop.f32.mrf.mxu1 }
 0x16f   : > { %v2094_v1 = vpop.f32.mrf.mxu0  ;;  %v1758_v10 = vadd.f32 %v1663_v59, %v6374_v25 }
 0x170   : > { %v6553_v22 = vadd.f32 %v2094_v1, %v1754_v29  ;;  %v4842_v12 = vpop.f32.mrf.mxu1 }
 0x171   : > { %v4876_v61 = vpop.f32.mrf.mxu0  ;;  %v1761_v55 = vadd.f32 %v4842_v12, %v6381_v53 }
 0x172   : > { %v6556_v28 = vadd.f32 %v4876_v61, %v1757_v37  ;;  %v1666_v18 = vpop.f32.mrf.mxu1 }
 0x173   : > { %v2097_v2 = vpop.f32.mrf.mxu0  ;;  %v1759_v44 = vadd.f32 %v1666_v18, %v6387_v42 }
 0x174   : > { %v6559_v23 = vadd.f32 %v2097_v2, %v1755_v63  ;;  %v4845_v0 = vpop.f32.mrf.mxu1 }
 0x175   : > { %v4879_v7 = vpop.f32.mrf.mxu0  ;;  %v1764_v40 = vadd.f32 %v4845_v0, %v6392_v49 }
 0x176   : > { %v6562_v13 = vadd.f32 %v4879_v7, %v1760_v20  ;;  %v1679_v25 = vpop.f32.mrf.mxu1 }
 0x177   : > { %v2110_v4 = vpop.f32.mrf.mxu0  ;;  %v1762_v58 = vadd.f32 %v1679_v25, %v6401_v8 }
 0x178   : > { %v6565_v39 = vadd.f32 %v2110_v4, %v1758_v10  ;;  %v4846_v53 = vpop.f32.mrf.mxu1 }
 0x179   : > { %v4880_v19 = vpop.f32.mrf.mxu0  ;;  %v1765_v29 = vadd.f32 %v4846_v53, %v6407_v62 }
 0x17a   : > { %v6568_v36 = vadd.f32 %v4880_v19, %v1761_v55  ;;  %v1682_v42 = vpop.f32.mrf.mxu1 }
 0x17b   : > { %v2113_v57 = vpop.f32.mrf.mxu0  ;;  %v1763_v37 = vadd.f32 %v1682_v42, %v6412_v50  ;;  %v7030_v42 = vld [vmem:[#allocation12_spill] sm:$0xff] }
 0x17c   : > { %v6571_v51 = vadd.f32 %v2113_v57, %v1759_v44  ;;  %v4849_v49 = vpop.f32.mrf.mxu1  ;;  %v5266_v57 = vmov 0.0  }
 0x17d   : > { %v4883_v33 = vpop.f32.mrf.mxu0  ;;  %v1768_v63 = vadd.f32 %v4849_v49, %v6418_v35  ;;  %5049 = vmatprep.subr.mxu1 %v5266_v57  ;;  %5081 = vmatprep.mubr.msk.f32.mxu1 %vm5267_vm8, %v5266_v57 }
 0x17e   : > { %v6574_v21 = vadd.f32 %v4883_v33, %v1764_v40  ;;  %v1695_v8 = vpop.f32.mrf.mxu1 }
 0x17f   : > { %v2126_v31 = vpop.f32.mrf.mxu0  ;;  %v1766_v20 = vadd.f32 %v1695_v8, %v6425_v48 }
 0x180   : > { %v6577_v27 = vadd.f32 %v2126_v31, %v1762_v58  ;;  %v4850_v62 = vpop.f32.mrf.mxu1 }
 0x181   : > { %v4884_v1 = vpop.f32.mrf.mxu0  ;;  %v1769_v10 = vadd.f32 %v4850_v62, %v6433_v60 }
 0x182   : > { %v6580_v59 = vadd.f32 %v4884_v1, %v1765_v29  ;;  %v1698_v50 = vpop.f32.mrf.mxu1 }
 0x183   : > { %v2129_v61 = vpop.f32.mrf.mxu0  ;;  %v1767_v55 = vadd.f32 %v1698_v50, %v6439_v26  ;;  %v4128_v26 = vld [vmem:[%s6988_s5 + $0x78] sm:$0xff]  ;;  %v4126_v50 = vld [vmem:[%s6988_s5 + $0x68] sm:$0xff] }
 0x184   : > { %v6583_v12 = vadd.f32 %v2129_v61, %v1763_v37  ;;  %v4853_v35 = vpop.f32.mrf.mxu1  ;;  %5050 = vmatpush3.msra.mxu1 %v4128_v26 }
 0x185   : > { %v4887_v2 = vpop.f32.mrf.mxu0  ;;  %v1772_v44 = vadd.f32 %v4853_v35, %v6444_v34  ;;  %5051 = vmatprep.subr.mxu1 %v5266_v57 }
 0x186   : > { %v6586_v18 = vadd.f32 %v4887_v2, %v1768_v63  ;;  %v1711_v48 = vpop.f32.mrf.mxu1 }
 0x187   : > { %v2142_v7 = vpop.f32.mrf.mxu0  ;;  %v1770_v40 = vadd.f32 %v1711_v48, %v6453_v56  ;;  %v1011_v56 = vadd.f32 %v6456_v11, %v7030_v42 }
 0x188   : > { %v6589_v0 = vadd.f32 %v2142_v7, %v1766_v20  ;;  %v4854_v60 = vpop.f32.mrf.mxu1 }
 0x189   : > { %v4888_v4 = vpop.f32.mrf.mxu0  ;;  %v1773_v58 = vadd.f32 %v4854_v60, %v6461_v43  ;;  %v4127_v43 = vld [vmem:[%s6988_s5 + $0x70] sm:$0xff]  ;;  %v1335_v63 = vadd.f32 %v6479_v5, %v1011_v56 }
 0x18a   : > { %v6592_v25 = vadd.f32 %v4888_v4, %v1769_v10  ;;  %v1714_v34 = vpop.f32.mrf.mxu1  ;;  %5052 = vmatpush3.msra.mxu1 %v4127_v43  ;;  %v4125_v4 = vld [vmem:[%s6988_s5 + $0x60] sm:$0xff] }
 0x18b   : > { %v2145_v19 = vpop.f32.mrf.mxu0  ;;  %v1771_v33 = vadd.f32 %v1714_v34, %v6466_v41  ;;  %5053 = vmatprep.subr.mxu1 %v5266_v57 }
 0x18c   : > { %v6598_v53 = vadd.f32 %v2145_v19, %v1767_v55  ;;  %v4857_v49 = vpop.f32.mrf.mxu1  ;;  %5054 = vmatpush3.msra.mxu1 %v4126_v50 }
 0x18d   : > { %v4891_v29 = vpop.f32.mrf.mxu0  ;;  %v1776_v8 = vadd.f32 %v4857_v49, %v6474_v52  ;;  %5055 = vmatprep.subr.mxu1 %v5266_v57 }
 0x18e   : > { %v6604_v37 = vadd.f32 %v4891_v29, %v1772_v44  ;;  %v1727_v11 = vpop.f32.mrf.mxu1  ;;  %5056 = vmatpush3.msra.mxu1 %v4125_v4  ;;  %v4124_v29 = vld [vmem:[%s6988_s5 + $0x58] sm:$0xff] }
 0x18f   : > { %v2158_v31 = vpop.f32.mrf.mxu0  ;;  %v1774_v41 = vadd.f32 %v1727_v11, %v1335_v63  ;;  %5057 = vmatprep.subr.mxu1 %v5266_v57 }
 0x190   : > { %v6612_v1 = vadd.f32 %v2158_v31, %v1770_v40  ;;  %v4858_v61 = vpop.f32.mrf.mxu1  ;;  %5058 = vmatpush3.msra.mxu1 %v4124_v29 }
 0x191   : > { %v4892_v20 = vpop.f32.mrf.mxu0  ;;  %v1777_v5 = vadd.f32 %v4858_v61, %v6489_v47  ;;  %5059 = vmatprep.subr.mxu1 %v5266_v57 }
 0x192   : > { %v6615_v62 = vadd.f32 %v4892_v20, %v1773_v58  ;;  %v1730_v52 = vpop.f32.mrf.mxu1 }
 0x193   : > { %v2161_v10 = vpop.f32.mrf.mxu0  ;;  %v1775_v35 = vadd.f32 %v1730_v52, %v6495_v32 }
 0x194   : > { %v6621_v2 = vadd.f32 %v2161_v10, %v1771_v33  ;;  %v4901_v44 = vpop.f32.mrf.mxu1 }
 0x195   : > { %v4895_v55 = vpop.f32.mrf.mxu0  ;;  %v2505_v40 = vadd.f32 %v4901_v44, %v6500_v14 }
 0x196   : > { %v6625_v7 = vadd.f32 %v4895_v55, %v1776_v8  ;;  %v2360_v60 = vpop.f32.mrf.mxu1 }
 0x197   : > { %v2174_v48 = vpop.f32.mrf.mxu0  ;;  %v2503_v26 = vadd.f32 %v2360_v60, %v6507_v45 }
 0x198   : > { %v6631_v47 = vadd.f32 %v2174_v48, %v1774_v41  ;;  %v4902_v58 = vpop.f32.mrf.mxu1  ;;  %v4122_v48 = vld [vmem:[%s6988_s5 + $0x48] sm:$0xff] }
 0x199   : > { %v4896_v19 = vpop.f32.mrf.mxu0  ;;  %v2506_v42 = vadd.f32 %v4902_v58, %v6511_v38 }
 0x19a   : > { %v6635_v32 = vadd.f32 %v4896_v19, %v1777_v5  ;;  %v2363_v56 = vpop.f32.mrf.mxu1 }
 0x19b   : > { %v2177_v34 = vpop.f32.mrf.mxu0  ;;  %v2504_v49 = vadd.f32 %v2363_v56, %v6516_v3  ;;  %v4123_v3 = vld [vmem:[%s6988_s5 + $0x50] sm:$0xff] }
 0x19c   : > { %v6641_v14 = vadd.f32 %v2177_v34, %v1775_v35  ;;  %v4905_v31 = vpop.f32.mrf.mxu1  ;;  %5060 = vmatpush3.msra.mxu1 %v4123_v3  ;;  %v4121_v34 = vld [vmem:[%s6988_s5 + $0x40] sm:$0xff]  ;;  %v4119_v3 = vld [vmem:[%s6988_s5 + $0x30] sm:$0xff] }
 0x19d   : > { %v4939_v33 = vpop.f32.mrf.mxu0  ;;  %v2509_v63 = vadd.f32 %v4905_v31, %v6521_v46  ;;  %5061 = vmatprep.subr.mxu1 %v5266_v57 }
 0x19e   : > { %v6645_v45 = vadd.f32 %v4939_v33, %v2505_v40  ;;  %v2376_v11 = vpop.f32.mrf.mxu1  ;;  %5062 = vmatpush3.msra.mxu1 %v4122_v48 }
 0x19f   : > { %v2799_v43 = vpop.f32.mrf.mxu0  ;;  %v2507_v38 = vadd.f32 %v2376_v11, %v6527_v24  ;;  %5063 = vmatprep.subr.mxu1 %v5266_v57 }
 0x1a0   : > { %v6648_v8 = vadd.f32 %v2799_v43, %v2503_v26  ;;  %v4906_v61 = vpop.f32.mrf.mxu1  ;;  %5064 = vmatpush3.msra.mxu1 %v4121_v34  ;;  %v4120_v43 = vld [vmem:[%s6988_s5 + $0x38] sm:$0xff] }
 0x1a1   : > { %v4940_v20 = vpop.f32.mrf.mxu0  ;;  %v2510_v50 = vadd.f32 %v4906_v61, %v6530_v15  ;;  %5065 = vmatprep.subr.mxu1 %v5266_v57 }
 0x1a2   : > { %v6651_v41 = vadd.f32 %v4940_v20, %v2506_v42  ;;  %v2379_v46 = vpop.f32.mrf.mxu1  ;;  %5066 = vmatpush3.msra.mxu1 %v4120_v43 }
 0x1a3   : > { %v2802_v10 = vpop.f32.mrf.mxu0  ;;  %v2508_v55 = vadd.f32 %v2379_v46, %v6534_v30  ;;  %5067 = vmatprep.subr.mxu1 %v5266_v57 }
 0x1a4   : > { %v6657_v5 = vadd.f32 %v2802_v10, %v2504_v49  ;;  %v4909_v35 = vpop.f32.mrf.mxu1  ;;  %5068 = vmatpush3.msra.mxu1 %v4119_v3 }
 0x1a5   : > { %v4943_v52 = vpop.f32.mrf.mxu0  ;;  %v2513_v4 = vadd.f32 %v4909_v35, %v6538_v54  ;;  %5069 = vmatprep.subr.mxu1 %v5266_v57 }
 0x1a6   : > { %v6661_v24 = vadd.f32 %v4943_v52, %v2509_v63  ;;  %v2392_v40 = vpop.f32.mrf.mxu1 }
 0x1a7   : > { %v2815_v44 = vpop.f32.mrf.mxu0  ;;  %v2511_v19 = vadd.f32 %v2392_v40, %v6541_v16 }
 0x1a8   : > { %v6667_v15 = vadd.f32 %v2815_v44, %v2507_v38  ;;  %v4910_v26 = vpop.f32.mrf.mxu1 }
 0x1a9   : > { %v4944_v60 = vpop.f32.mrf.mxu0  ;;  %v2514_v29 = vadd.f32 %v4910_v26, %v6544_v9 }
 0x1aa   : > { %v6671_v30 = vadd.f32 %v4944_v60, %v2510_v50  ;;  %v2395_v42 = vpop.f32.mrf.mxu1 }
 0x1ab   : > { %v2818_v58 = vpop.f32.mrf.mxu0  ;;  %v2512_v33 = vadd.f32 %v2395_v42, %v6547_v17 }
 0x1ac   : > { %v6677_v54 = vadd.f32 %v2818_v58, %v2508_v55  ;;  %v4913_v49 = vpop.f32.mrf.mxu1 }
 0x1ad   : > { %v4947_v56 = vpop.f32.mrf.mxu0  ;;  %v2517_v63 = vadd.f32 %v4913_v49, %v6550_v6 }
 0x1ae   : > { %v6681_v16 = vadd.f32 %v4947_v56, %v2513_v4  ;;  %v2408_v11 = vpop.f32.mrf.mxu1 }
 0x1af   : > { %v2831_v31 = vpop.f32.mrf.mxu0  ;;  %v2515_v38 = vadd.f32 %v2408_v11, %v6553_v22 }
 0x1b0   : > { %v6687_v9 = vadd.f32 %v2831_v31, %v2511_v19  ;;  %v4914_v61 = vpop.f32.mrf.mxu1 }
 0x1b1   : > { %v4948_v20 = vpop.f32.mrf.mxu0  ;;  %v2518_v50 = vadd.f32 %v4914_v61, %v6556_v28 }
 0x1b2   : > { %v6691_v17 = vadd.f32 %v4948_v20, %v2514_v29  ;;  %v2411_v46 = vpop.f32.mrf.mxu1 }
 0x1b3   : > { %v2834_v10 = vpop.f32.mrf.mxu0  ;;  %v2516_v55 = vadd.f32 %v2411_v46, %v6559_v23 }
 0x1b4   : > { %v6697_v6 = vadd.f32 %v2834_v10, %v2512_v33  ;;  %v4917_v35 = vpop.f32.mrf.mxu1 }
 0x1b5   : > { %v4951_v52 = vpop.f32.mrf.mxu0  ;;  %v2521_v48 = vadd.f32 %v4917_v35, %v6562_v13 }
 0x1b6   : > { %v6701_v22 = vadd.f32 %v4951_v52, %v2517_v63  ;;  %v2424_v40 = vpop.f32.mrf.mxu1  ;;  %v4114_v52 = vld [vmem:[%s6988_s5 + $0x8] sm:$0xff] }
 0x1b7   : > { %v2847_v44 = vpop.f32.mrf.mxu0  ;;  %v2519_v28 = vadd.f32 %v2424_v40, %v6565_v39  ;;  %v4118_v39 = vld [vmem:[%s6988_s5 + $0x28] sm:$0xff] }
 0x1b8   : > { %v6704_v4 = vadd.f32 %v2847_v44, %v2515_v38  ;;  %v4918_v26 = vpop.f32.mrf.mxu1  ;;  %5070 = vmatpush3.msra.mxu1 %v4118_v39 }
 0x1b9   : > { %v4952_v60 = vpop.f32.mrf.mxu0  ;;  %v2522_v34 = vadd.f32 %v4918_v26, %v6568_v36  ;;  %5071 = vmatprep.subr.mxu1 %v5266_v57 }
 0x1ba   : > { %v6707_v19 = vadd.f32 %v4952_v60, %v2518_v50  ;;  %v2427_v23 = vpop.f32.mrf.mxu1 }
 0x1bb   : > { %v2850_v58 = vpop.f32.mrf.mxu0  ;;  %v2520_v56 = vadd.f32 %v2427_v23, %v6571_v51  ;;  %v4117_v51 = vld [vmem:[%s6988_s5 + $0x20] sm:$0xff] }
 0x1bc   : > { %v6710_v29 = vadd.f32 %v2850_v58, %v2516_v55  ;;  %v4921_v13 = vpop.f32.mrf.mxu1  ;;  %5072 = vmatpush3.msra.mxu1 %v4117_v51 }
 0x1bd   : > { %v4955_v42 = vpop.f32.mrf.mxu0  ;;  %v2525_v31 = vadd.f32 %v4921_v13, %v6574_v21  ;;  %5073 = vmatprep.subr.mxu1 %v5266_v57  ;;  %v4116_v21 = vld [vmem:[%s6988_s5 + $0x18] sm:$0xff] }
 0x1be   : > { %v6713_v33 = vadd.f32 %v4955_v42, %v2521_v48  ;;  %v2440_v36 = vpop.f32.mrf.mxu1  ;;  %5074 = vmatpush3.msra.mxu1 %v4116_v21  ;;  %v4113_v48 = vld [vmem:[%s6988_s5] sm:$0xff] }
 0x1bf   : > { %v2863_v49 = vpop.f32.mrf.mxu0  ;;  %v2523_v11 = vadd.f32 %v2440_v36, %v6577_v27  ;;  %5075 = vmatprep.subr.mxu1 %v5266_v57  ;;  %v4115_v27 = vld [vmem:[%s6988_s5 + $0x10] sm:$0xff] }
 0x1c0   : > { %v6719_v43 = vadd.f32 %v2863_v49, %v2519_v28  ;;  %v4922_v38 = vpop.f32.mrf.mxu1  ;;  %5076 = vmatpush3.msra.mxu1 %v4115_v27  ;;  %v6760_v49 = vpop.permute.xlu0 %3856 }
 0x1c1   : > { %v4956_v63 = vpop.f32.mrf.mxu0  ;;  %v2526_v10 = vadd.f32 %v4922_v38, %v6580_v59  ;;  %5077 = vmatprep.subr.mxu1 %v5266_v57 }
 0x1c2   : > { %v6726_v20 = vadd.f32 %v4956_v63, %v2522_v34  ;;  %v2443_v50 = vpop.f32.mrf.mxu1  ;;  %5078 = vmatpush3.msra.mxu1 %v4114_v52 }
 0x1c3   : > { %v2866_v61 = vpop.f32.mrf.mxu0  ;;  %v2524_v55 = vadd.f32 %v2443_v50, %v6583_v12  ;;  %5079 = vmatprep.subr.mxu1 %v5266_v57 }
 0x1c4   : > { %v6733_v3 = vadd.f32 %v2866_v61, %v2520_v56  ;;  %v4925_v59 = vpop.f32.mrf.mxu1  ;;  %5080 = vmatpush3.msra.mxu1 %v4113_v48  ;;  %v6773_v50 = vpop.permute.xlu0 %3861 }
 0x1c5   : > { %v4959_v46 = vpop.f32.mrf.mxu0  ;;  %v2529_v40 = vadd.f32 %v4925_v59, %v6586_v18 }
 0x1c6   : > { %v6743_v35 = vadd.f32 %v4959_v46, %v2525_v31  ;;  %v2456_v12 = vpop.f32.mrf.mxu1 }
 0x1c7   : > { %v2879_v44 = vpop.f32.mrf.mxu0  ;;  %v2527_v26 = vadd.f32 %v2456_v12, %v6589_v0  ;;  %v6765_v0 = vpop.permute.xlu1 %3866 }
 0x1c8   : > { %v6751_v60 = vadd.f32 %v2879_v44, %v2523_v11  ;;  %v4926_v34 = vpop.f32.mrf.mxu1 }
 0x1c9   : > { %v4960_v28 = vpop.f32.mrf.mxu0  ;;  %v2530_v42 = vadd.f32 %v4926_v34, %v6592_v25 }
 0x1ca   : > { %v6755_v58 = vadd.f32 %v4960_v28, %v2526_v10  ;;  %v2459_v13 = vpop.f32.mrf.mxu1 }
 0x1cb   : > { %v2882_v23 = vpop.f32.mrf.mxu0  ;;  %v2528_v39 = vadd.f32 %v2459_v13, %v6598_v53 }
 0x1cc   : > { %v6758_v56 = vadd.f32 %v2882_v23, %v2524_v55  ;;  %v4929_v57 = vpop.f32.mrf.mxu1  ;;  %v6778_v55 = vpop.permute.xlu1 %3871 }
 0x1cd   : > { %v4963_v18 = vpop.f32.mrf.mxu0  ;;  %v2533_v63 = vadd.f32 %v4929_v57, %v6604_v37 }
 0x1ce   : > { %v6763_v31 = vadd.f32 %v4963_v18, %v2529_v40  ;;  %v2472_v11 = vpop.f32.mrf.mxu1 }
 0x1cf   : > { %v2895_v36 = vpop.f32.mrf.mxu0  ;;  %v2531_v38 = vadd.f32 %v2472_v11, %v6612_v1 }
 0x1d0   : > { %v6768_v51 = vadd.f32 %v2895_v36, %v2527_v26  ;;  %v4930_v21 = vpop.f32.mrf.mxu1  ;;  %v6786_v26 = vpop.permute.xlu0 %3876 }
 0x1d1   : > { %v4964_v25 = vpop.f32.mrf.mxu0  ;;  %v2534_v53 = vadd.f32 %v4930_v21, %v6615_v62  ;;  %v6791_v13 = vpop.permute.xlu1 %3881 }
 0x1d2   : > { %v6771_v61 = vadd.f32 %v4964_v25, %v2530_v42  ;;  %v2475_v27 = vpop.f32.mrf.mxu1 }
 0x1d3   : > { %v2898_v10 = vpop.f32.mrf.mxu0  ;;  %v2532_v37 = vadd.f32 %v2475_v27, %v6621_v2 }
 0x1d4   : > { %v6776_v46 = vadd.f32 %v2898_v10, %v2528_v39  ;;  %v4933_v44 = vpop.f32.mrf.mxu1  ;;  %v6799_v25 = vpop.permute.xlu0 %3886 }
 0x1d5   : > { %v4967_v52 = vpop.f32.mrf.mxu0  ;;  %v2537_v48 = vadd.f32 %v4933_v44, %v6625_v7  ;;  %v6803_v10 = vpop.permute.xlu1 %3891 }
 0x1d6   : > { %v6781_v59 = vadd.f32 %v4967_v52, %v2533_v63  ;;  %v2488_v12 = vpop.f32.mrf.mxu1 }
 0x1d7   : > { %v2911_v1 = vpop.f32.mrf.mxu0  ;;  %v2535_v62 = vadd.f32 %v2488_v12, %v6631_v47 }
 0x1d8   : > { %v6784_v40 = vadd.f32 %v2911_v1, %v2531_v38  ;;  %v4934_v23 = vpop.f32.mrf.mxu1  ;;  %v6809_v44 = vpop.permute.xlu0 %3896 }
 0x1d9   : > { %v4968_v28 = vpop.f32.mrf.mxu0  ;;  %v2538_v2 = vadd.f32 %v4934_v23, %v6635_v32 }
 0x1da   : > { %v6789_v34 = vadd.f32 %v4968_v28, %v2534_v53  ;;  %v2491_v39 = vpop.f32.mrf.mxu1 }
 0x1db   : > { %v2914_v42 = vpop.f32.mrf.mxu0  ;;  %v2536_v57 = vadd.f32 %v2491_v39, %v6641_v14  ;;  %v6819_v39 = vld [vmem:[%s6985_s2] ss:$0 sm:$0xff] }
 0x1dc   : > { %v6794_v18 = vadd.f32 %v2914_v42, %v2532_v37  ;;  %v4977_v63 = vpop.f32.mrf.mxu1 }
 0x1dd   : > { %v4971_v7 = vpop.f32.mrf.mxu0  ;;  %v3391_v1 = vadd.f32 %v4977_v63, %v6645_v45 }
 0x1de   : > { %7031 = vst [vmem:[#allocation5_spill] sm:$0xff] %v6794_v18  ;;  %v6797_v36 = vadd.f32 %v4971_v7, %v2537_v48  ;;  %v3246_v38 = vpop.f32.mrf.mxu1 }
 0x1df   : > { %v2927_v11 = vpop.f32.mrf.mxu0  ;;  %v3389_v48 = vadd.f32 %v3246_v38, %v6648_v8 }
 0x1e0   : > { %7032 = vst [vmem:[#allocation13_spill] sm:$0xff] %v6797_v36  ;;  %v6801_v47 = vadd.f32 %v2927_v11, %v2535_v62  ;;  %v4978_v32 = vpop.f32.mrf.mxu1  ;;  %v6813_v62 = vpop.permute.xlu1 %3901 }
 0x1e1   : > { %v4972_v21 = vpop.f32.mrf.mxu0 }
 0x1e2   : > { %7033 = vst [vmem:[#allocation15_spill] sm:$0xff] %v6801_v47  ;;  %v6805_v53 = vadd.f32 %v4972_v21, %v2538_v2  ;;  %v3249_v37 = vpop.f32.mrf.mxu1  ;;  %v3392_v2 = vadd.f32 %v4978_v32, %v6651_v41  ;;  %v6823_v21 = vpop.permute.xlu0 %3906 }
 0x1e3   : > { %v2930_v27 = vpop.f32.mrf.mxu0  ;;  %v3390_v45 = vadd.f32 %v3249_v37, %v6657_v5 }
 0x1e4   : > { %7034 = vst [vmem:[#allocation6_spill] sm:$0xff] %v6805_v53  ;;  %v6807_v52 = vadd.f32 %v2930_v27, %v2536_v57  ;;  %v4981_v12 = vpop.f32.mrf.mxu1 }
 0x1e5   : > { %v5015_v14 = vpop.f32.mrf.mxu0 }
 0x1e6   : > { %7035 = vst [vmem:[#allocation7_spill] sm:$0xff] %v6807_v52  ;;  %v3705_v23 = vadd.f32 %v5015_v14, %v3391_v1  ;;  %v3262_v7 = vpop.f32.mrf.mxu1  ;;  %v6826_v1 = vpop.permute.xlu1 %3911  ;;  %v3395_v52 = vadd.f32 %v4981_v12, %v6661_v24 }
 0x1e7   : > { %v3560_v28 = vpop.f32.mrf.mxu0  ;;  %v6833_v18 = vpop.permute.xlu0 %3916 }
 0x1e8   : > { %v3703_v42 = vadd.f32 %v3560_v28, %v3389_v48  ;;  %v4982_v8 = vpop.f32.mrf.mxu1  ;;  %v3748_v27 = vadd.f32 %v6819_v39, %v3705_v23  ;;  %v3393_v48 = vadd.f32 %v3262_v7, %v6667_v15 }
 0x1e9   : > { %v5016_v57 = vpop.f32.mrf.mxu0  ;;  %v3396_v23 = vadd.f32 %v4982_v8, %v6671_v30 }
 0x1ea   : > { %v3746_v11 = vadd.f32 %v6819_v39, %v3703_v42  ;;  %v3706_v63 = vadd.f32 %v5016_v57, %v3392_v2  ;;  %v3265_v14 = vpop.f32.mrf.mxu1  ;;  %v3784_v57 = vmax.f32 %v3748_v27, 0.0 }
 0x1eb   : > { %v3563_v38 = vpop.f32.mrf.mxu0  ;;  %v3394_v7 = vadd.f32 %v3265_v14, %v6677_v54 }
 0x1ec   : > { %v3704_v41 = vadd.f32 %v3563_v38, %v3390_v45  ;;  %v3782_v28 = vmax.f32 %v3746_v11, 0.0  ;;  %v3749_v42 = vadd.f32 %v6819_v39, %v3706_v63  ;;  %v4985_v37 = vpop.f32.mrf.mxu1  ;;  %v4036_v30 = vmul.f32 %v6765_v0, %v3784_v57 }
 0x1ed   : > { %v5019_v32 = vpop.f32.mrf.mxu0 }
 0x1ee   : > { %v3747_v5 = vadd.f32 %v6819_v39, %v3704_v41  ;;  %v3709_v45 = vadd.f32 %v5019_v32, %v3395_v52  ;;  %v3278_v38 = vpop.f32.mrf.mxu1  ;;  %v4034_v15 = vmul.f32 %v6760_v49, %v3782_v28  ;;  %v3785_v12 = vmax.f32 %v3749_v42, 0.0 }
 0x1ef   : > { %v3576_v2 = vpop.f32.mrf.mxu0  ;;  %v3397_v54 = vadd.f32 %v3278_v38, %v6687_v9 }
 0x1f0   : > { %v3707_v53 = vadd.f32 %v3576_v2, %v3393_v48  ;;  %v3783_v36 = vmax.f32 %v3747_v5, 0.0  ;;  %v4986_v63 = vpop.f32.mrf.mxu1  ;;  %v6839_v48 = vpop.permute.xlu1 %3921  ;;  %v3752_v8 = vadd.f32 %v6819_v39, %v3709_v45 }
 0x1f1   : > { %v5020_v47 = vpop.f32.mrf.mxu0  ;;  %v6848_v2 = vpop.permute.xlu0 %3926  ;;  %v3400_v57 = vadd.f32 %v4986_v63, %v6691_v17 }
 0x1f2   : > { %v3750_v24 = vadd.f32 %v6819_v39, %v3707_v53  ;;  %v4035_v11 = vmul.f32 %v6773_v50, %v3783_v36  ;;  %v3710_v27 = vadd.f32 %v5020_v47, %v3396_v23  ;;  %v3281_v5 = vpop.f32.mrf.mxu1  ;;  %v3399_v53 = vadd.f32 %v4985_v37, %v6681_v16 }
 0x1f3   : > { %v3579_v41 = vpop.f32.mrf.mxu0  ;;  %v4037_v50 = vmul.f32 %v6778_v55, %v3785_v12 }
 0x1f4   : > { %v4070_v52 = vadd.f32 %v4035_v11, %v4034_v15  ;;  %v3786_v32 = vmax.f32 %v3750_v24, 0.0  ;;  %v3708_v49 = vadd.f32 %v3579_v41, %v3394_v7  ;;  %v3753_v47 = vadd.f32 %v6819_v39, %v3710_v27  ;;  %v4989_v42 = vpop.f32.mrf.mxu1  ;;  %v6852_v24 = vpop.permute.xlu1 %3931 }
 0x1f5   : > { %v5023_v28 = vpop.f32.mrf.mxu0  ;;  %v3788_v15 = vmax.f32 %v3752_v8, 0.0  ;;  %v3398_v41 = vadd.f32 %v3281_v5, %v6697_v6  ;;  %v3403_v5 = vadd.f32 %v4989_v42, %v6701_v22 }
 0x1f6   : > { %v4071_v36 = vadd.f32 %v4070_v52, %v4036_v30  ;;  %v3751_v14 = vadd.f32 %v6819_v39, %v3708_v49  ;;  %v3713_v23 = vadd.f32 %v5023_v28, %v3399_v53  ;;  %v4038_v16 = vmul.f32 %v6786_v26, %v3786_v32  ;;  %v3294_v38 = vpop.f32.mrf.mxu1 }
 0x1f7   : > { %v3592_v0 = vpop.f32.mrf.mxu0  ;;  %v3789_v27 = vmax.f32 %v3753_v47, 0.0  ;;  %v4040_v26 = vmul.f32 %v6799_v25, %v3788_v15 }
 0x1f8   : > { %v3711_v45 = vadd.f32 %v3592_v0, %v3397_v54  ;;  %v4072_v37 = vadd.f32 %v4071_v36, %v4037_v50  ;;  %v3787_v9 = vmax.f32 %v3751_v14, 0.0  ;;  %v4990_v63 = vpop.f32.mrf.mxu1  ;;  %v3756_v52 = vadd.f32 %v6819_v39, %v3713_v23  ;;  %v6859_v54 = vpop.permute.xlu0 %3936 }
 0x1f9   : > { %v5024_v55 = vpop.f32.mrf.mxu0  ;;  %v3401_v50 = vadd.f32 %v3294_v38, %v6704_v4  ;;  %v4041_v6 = vmul.f32 %v6803_v10, %v3789_v27  ;;  %v6866_v0 = vpop.permute.xlu1 %3941  ;;  %v3404_v23 = vadd.f32 %v4990_v63, %v6707_v19 }
 0x1fa   : > { %v3754_v12 = vadd.f32 %v6819_v39, %v3711_v45  ;;  %v3714_v7 = vadd.f32 %v5024_v55, %v3400_v57  ;;  %v4073_v11 = vadd.f32 %v4072_v37, %v4038_v16  ;;  %v4039_v17 = vmul.f32 %v6791_v13, %v3787_v9  ;;  %v3297_v49 = vpop.f32.mrf.mxu1 }
 0x1fb   : > { %v3595_v30 = vpop.f32.mrf.mxu0  ;;  %v3792_v57 = vmax.f32 %v3756_v52, 0.0  ;;  %v3402_v55 = vadd.f32 %v3297_v49, %v6710_v29 }
 0x1fc   : > { %v4074_v8 = vadd.f32 %v4073_v11, %v4039_v17  ;;  %v3790_v32 = vmax.f32 %v3754_v12, 0.0  ;;  %v3712_v28 = vadd.f32 %v3595_v30, %v3398_v41  ;;  %v3757_v36 = vadd.f32 %v6819_v39, %v3714_v7  ;;  %v4993_v14 = vpop.f32.mrf.mxu1  ;;  %v6873_v19 = vpop.permute.xlu0 %3946 }
 0x1fd   : > { %v5027_v53 = vpop.f32.mrf.mxu0  ;;  %v3407_v29 = vadd.f32 %v4993_v14, %v6713_v33 }
 0x1fe   : > { %v4075_v13 = vadd.f32 %v4074_v8, %v4040_v26  ;;  %v3755_v47 = vadd.f32 %v6819_v39, %v3712_v28  ;;  %v4042_v15 = vmul.f32 %v6809_v44, %v3790_v32  ;;  %v3717_v37 = vadd.f32 %v5027_v53, %v3403_v5  ;;  %v3310_v9 = vpop.f32.mrf.mxu1  ;;  %v6877_v8 = vpop.permute.xlu1 %3951 }
 0x1ff   : > { %v3608_v25 = vpop.f32.mrf.mxu0  ;;  %v3793_v38 = vmax.f32 %v3757_v36, 0.0  ;;  %v4044_v44 = vmul.f32 %v6823_v21, %v3792_v57 }
 0x200   : > { %v3715_v45 = vadd.f32 %v3608_v25, %v3401_v50  ;;  %v4076_v4 = vadd.f32 %v4075_v13, %v4041_v6  ;;  %v3791_v16 = vmax.f32 %v3755_v47, 0.0  ;;  %v4994_v7 = vpop.f32.mrf.mxu1  ;;  %v3760_v17 = vadd.f32 %v6819_v39, %v3717_v37  ;;  %v6886_v57 = vpop.permute.xlu0 %3956 }
 0x201   : > { %v5028_v10 = vpop.f32.mrf.mxu0  ;;  %v4045_v32 = vmul.f32 %v6826_v1, %v3793_v38  ;;  %v3408_v36 = vadd.f32 %v4994_v7, %v6726_v20 }
 0x202   : > { %v3758_v22 = vadd.f32 %v6819_v39, %v3715_v45  ;;  %v4077_v42 = vadd.f32 %v4076_v4, %v4042_v15  ;;  %v4043_v12 = vmul.f32 %v6813_v62, %v3791_v16  ;;  %v3718_v11 = vadd.f32 %v5028_v10, %v3404_v23  ;;  %v3313_v30 = vpop.f32.mrf.mxu1 }
 0x203   : > { %v3611_v27 = vpop.f32.mrf.mxu0  ;;  %v3405_v62 = vadd.f32 %v3310_v9, %v6719_v43  ;;  %v3796_v5 = vmax.f32 %v3760_v17, 0.0  ;;  %v3406_v4 = vadd.f32 %v3313_v30, %v6733_v3  ;;  %v6891_v9 = vpop.permute.xlu1 %3961 }
 0x204   : > { %v4078_v41 = vadd.f32 %v4077_v42, %v4043_v12  ;;  %v3794_v63 = vmax.f32 %v3758_v22, 0.0  ;;  %v3716_v52 = vadd.f32 %v3611_v27, %v3402_v55  ;;  %v3761_v28 = vadd.f32 %v6819_v39, %v3718_v11  ;;  %v4997_v53 = vpop.f32.mrf.mxu1 }
 0x205   : > { %v5031_v26 = vpop.f32.mrf.mxu0  ;;  %v4048_v10 = vmul.f32 %v6848_v2, %v3796_v5  ;;  %v3411_v27 = vadd.f32 %v4997_v53, %v6743_v35 }
 0x206   : > { %v4079_v49 = vadd.f32 %v4078_v41, %v4044_v44  ;;  %v3759_v21 = vadd.f32 %v6819_v39, %v3716_v52  ;;  %v3721_v6 = vadd.f32 %v5031_v26, %v3407_v29  ;;  %v4046_v47 = vmul.f32 %v6833_v18, %v3794_v63  ;;  %v3326_v14 = vpop.f32.mrf.mxu1  ;;  %v3967_v63 = vpop.permute.xlu0 %3966 }
 0x207   : > { %v3624_v50 = vpop.f32.mrf.mxu0  ;;  %v3797_v15 = vmax.f32 %v3761_v28, 0.0  ;;  %v3409_v7 = vadd.f32 %v3326_v14, %v6751_v60 }
 0x208   : > { %v3719_v13 = vadd.f32 %v3624_v50, %v3405_v62  ;;  %v4080_v25 = vadd.f32 %v4079_v49, %v4045_v32  ;;  %v3795_v33 = vmax.f32 %v3759_v21, 0.0  ;;  %v4998_v16 = vpop.f32.mrf.mxu1  ;;  %v3764_v18 = vadd.f32 %v6819_v39, %v3721_v6 }
 0x209   : > { %v5032_v43 = vpop.f32.mrf.mxu0  ;;  %v4049_v3 = vmul.f32 %v6852_v24, %v3797_v15  ;;  %v3412_v30 = vadd.f32 %v4998_v16, %v6755_v58  ;;  %v3972_v24 = vpop.permute.xlu1 %3971 }
 0x20a   : > { %v3762_v1 = vadd.f32 %v6819_v39, %v3719_v13  ;;  %v3722_v23 = vadd.f32 %v5032_v43, %v3408_v36  ;;  %v4081_v45 = vadd.f32 %v4080_v25, %v4046_v47  ;;  %v4047_v20 = vmul.f32 %v6839_v48, %v3795_v33  ;;  %v3329_v42 = vpop.f32.mrf.mxu1  ;;  %v3977_v43 = vpop.permute.xlu0 %3976 }
 0x20b   : > { %v3627_v37 = vpop.f32.mrf.mxu0  ;;  %v3800_v2 = vmax.f32 %v3764_v18, 0.0  ;;  %v3410_v53 = vadd.f32 %v3329_v42, %v6758_v56 }
 0x20c   : > { %v4082_v38 = vadd.f32 %v4081_v45, %v4047_v20  ;;  %v3798_v22 = vmax.f32 %v3762_v1, 0.0  ;;  %v3720_v55 = vadd.f32 %v3627_v37, %v3406_v4  ;;  %v3765_v11 = vadd.f32 %v6819_v39, %v3722_v23  ;;  %v5001_v41 = vpop.f32.mrf.mxu1 }
 0x20d   : > { %v5035_v12 = vpop.f32.mrf.mxu0  ;;  %v4052_v13 = vmul.f32 %v6873_v19, %v3800_v2  ;;  %v3415_v1 = vadd.f32 %v5001_v41, %v6763_v31  ;;  %v3982_v20 = vpop.permute.xlu1 %3981 }
 0x20e   : > { %v4083_v48 = vadd.f32 %v4082_v38, %v4048_v10  ;;  %v3763_v44 = vadd.f32 %v6819_v39, %v3720_v55  ;;  %v4050_v26 = vmul.f32 %v6859_v54, %v3798_v22  ;;  %v3725_v62 = vadd.f32 %v5035_v12, %v3411_v27  ;;  %v3342_v32 = vpop.f32.mrf.mxu1  ;;  %v3987_v27 = vpop.permute.xlu0 %3986 }
 0x20f   : > { %v3640_v17 = vpop.f32.mrf.mxu0  ;;  %v3801_v28 = vmax.f32 %v3765_v11, 0.0  ;;  %v3413_v23 = vadd.f32 %v3342_v32, %v6768_v51 }
 0x210   : > { %v3723_v52 = vadd.f32 %v3640_v17, %v3409_v7  ;;  %v4084_v29 = vadd.f32 %v4083_v48, %v4049_v3  ;;  %v3799_v60 = vmax.f32 %v3763_v44, 0.0  ;;  %v5002_v36 = vpop.f32.mrf.mxu1  ;;  %v3768_v5 = vadd.f32 %v6819_v39, %v3725_v62 }
 0x211   : > { %v5036_v49 = vpop.f32.mrf.mxu0  ;;  %v4053_v56 = vmul.f32 %v6877_v8, %v3801_v28  ;;  %v3416_v16 = vadd.f32 %v5002_v36, %v6771_v61 }
 0x212   : > { %v3766_v35 = vadd.f32 %v6819_v39, %v3723_v52  ;;  %v4085_v21 = vadd.f32 %v4084_v29, %v4050_v26  ;;  %v4051_v50 = vmul.f32 %v6866_v0, %v3799_v60  ;;  %v3726_v6 = vadd.f32 %v5036_v49, %v3412_v30  ;;  %v3345_v25 = vpop.f32.mrf.mxu1  ;;  %v3992_v26 = vpop.permute.xlu1 %3991 }
 0x213   : > { %v3643_v58 = vpop.f32.mrf.mxu0  ;;  %v3804_v10 = vmax.f32 %v3768_v5, 0.0  ;;  %v3414_v11 = vadd.f32 %v3345_v25, %v6776_v46  ;;  %v7036_v5 = vld [vmem:[#allocation5_spill] sm:$0xff] }
 0x214   : > { %v4086_v54 = vadd.f32 %v4085_v21, %v4051_v50  ;;  %v3802_v47 = vmax.f32 %v3766_v35, 0.0  ;;  %v3724_v33 = vadd.f32 %v3643_v58, %v3410_v53  ;;  %v3769_v45 = vadd.f32 %v6819_v39, %v3726_v6  ;;  %v5005_v19 = vpop.f32.mrf.mxu1 }
 0x215   : > { %v5039_v14 = vpop.f32.mrf.mxu0  ;;  %v4056_v41 = vmul.f32 %v3967_v63, %v3804_v10  ;;  %v3419_v29 = vadd.f32 %v5005_v19, %v6781_v59 }
 0x216   : > { %v4087_v0 = vadd.f32 %v4086_v54, %v4052_v13  ;;  %v3767_v15 = vadd.f32 %v6819_v39, %v3724_v33  ;;  %v3729_v37 = vadd.f32 %v5039_v14, %v3415_v1  ;;  %v4054_v38 = vmul.f32 %v6886_v57, %v3802_v47  ;;  %v3358_v51 = vpop.f32.mrf.mxu1  ;;  %v3997_v13 = vpop.permute.xlu0 %3996 }
 0x217   : > { %v3656_v4 = vpop.f32.mrf.mxu0  ;;  %v3805_v7 = vmax.f32 %v3769_v45, 0.0  ;;  %v3417_v60 = vadd.f32 %v3358_v51, %v6784_v40 }
 0x218   : > { %v3727_v18 = vadd.f32 %v3656_v4, %v3413_v23  ;;  %v4088_v31 = vadd.f32 %v4087_v0, %v4053_v56  ;;  %v3803_v22 = vmax.f32 %v3767_v15, 0.0  ;;  %v5006_v48 = vpop.f32.mrf.mxu1  ;;  %v3772_v44 = vadd.f32 %v6819_v39, %v3729_v37  ;;  %v4002_v23 = vpop.permute.xlu1 %4001  ;;  %v7037_v4 = vld [vmem:[#allocation15_spill] sm:$0xff] }
 0x219   : > { %v5040_v42 = vpop.f32.mrf.mxu0  ;;  %v4057_v62 = vmul.f32 %v3972_v24, %v3805_v7  ;;  %v3420_v36 = vadd.f32 %v5006_v48, %v6789_v34 }
 0x21a   : > { %v3770_v8 = vadd.f32 %v6819_v39, %v3727_v18  ;;  %v3730_v55 = vadd.f32 %v5040_v42, %v3416_v16  ;;  %v4089_v12 = vadd.f32 %v4088_v31, %v4054_v38  ;;  %v4055_v3 = vmul.f32 %v6891_v9, %v3803_v22  ;;  %v3361_v2 = vpop.f32.mrf.mxu1  ;;  %v7038_v18 = vld [vmem:[#allocation13_spill] sm:$0xff]  ;;  %v4007_v51 = vpop.permute.xlu0 %4006 }
 0x21b   : > { %v3659_v61 = vpop.f32.mrf.mxu0  ;;  %v3808_v35 = vmax.f32 %v3772_v44, 0.0  ;;  %v3418_v47 = vadd.f32 %v3361_v2, %v7036_v5  ;;  %v7040_v44 = vld [vmem:[#allocation7_spill] sm:$0xff] }
 0x21c   : > { %v4090_v57 = vadd.f32 %v4089_v12, %v4055_v3  ;;  %v3806_v17 = vmax.f32 %v3770_v8, 0.0  ;;  %v3728_v30 = vadd.f32 %v3659_v61, %v3414_v11  ;;  %v3773_v46 = vadd.f32 %v6819_v39, %v3730_v55  ;;  %v5009_v49 = vpop.f32.mrf.mxu1  ;;  %v7039_v8 = vld [vmem:[#allocation6_spill] sm:$0xff] }
 0x21d   : > { %v5043_v52 = vpop.f32.mrf.mxu0  ;;  %v4060_v56 = vmul.f32 %v3987_v27, %v3808_v35  ;;  %v3423_v10 = vadd.f32 %v5009_v49, %v7038_v18  ;;  %v4012_v27 = vpop.permute.xlu1 %4011 }
 0x21e   : > { %v4091_v9 = vadd.f32 %v4090_v57, %v4056_v41  ;;  %v3771_v32 = vadd.f32 %v6819_v39, %v3728_v30  ;;  %v3733_v63 = vadd.f32 %v5043_v52, %v3419_v29  ;;  %v4058_v53 = vmul.f32 %v3977_v43, %v3806_v17  ;;  %v3374_v58 = vpop.f32.mrf.mxu1 }
 0x21f   : > { %v3672_v28 = vpop.f32.mrf.mxu0  ;;  %v3809_v40 = vmax.f32 %v3773_v46, 0.0  ;;  %v3421_v16 = vadd.f32 %v3374_v58, %v7037_v4 }
 0x220   : > { %v3731_v21 = vadd.f32 %v3672_v28, %v3417_v60  ;;  %v4092_v50 = vadd.f32 %v4091_v9, %v4057_v62  ;;  %v3807_v6 = vmax.f32 %v3771_v32, 0.0  ;;  %v5010_v33 = vpop.f32.mrf.mxu1  ;;  %v3776_v43 = vadd.f32 %v6819_v39, %v3733_v63  ;;  %v4017_v32 = vpop.permute.xlu0 %4016 }
 0x221   : > { %v5044_v59 = vpop.f32.mrf.mxu0  ;;  %v4061_v19 = vmul.f32 %v3992_v26, %v3809_v40  ;;  %v3424_v55 = vadd.f32 %v5010_v33, %v7039_v8 }
 0x222   : > { %v3774_v54 = vadd.f32 %v6819_v39, %v3731_v21  ;;  %v4093_v24 = vadd.f32 %v4092_v50, %v4058_v53  ;;  %v4059_v25 = vmul.f32 %v3982_v20, %v3807_v6  ;;  %v3734_v14 = vadd.f32 %v5044_v59, %v3420_v36  ;;  %v3377_v20 = vpop.f32.mrf.mxu1  ;;  %v4022_v21 = vpop.permute.xlu1 %4021 }
 0x223   : > { %v3675_v1 = vpop.f32.mrf.mxu0  ;;  %v3812_v42 = vmax.f32 %v3776_v43, 0.0  ;;  %v3422_v41 = vadd.f32 %v3377_v20, %v7040_v44 }
 0x224   : > { %v4094_v0 = vadd.f32 %v4093_v24, %v4059_v25  ;;  %v3810_v34 = vmax.f32 %v3774_v54, 0.0  ;;  %v3732_v45 = vadd.f32 %v3675_v1, %v3418_v47  ;;  %v3777_v38 = vadd.f32 %v6819_v39, %v3734_v14  ;;  %v4027_v40 = vpop.permute.xlu0 %4026 }
 0x225   : > { %v5047_v15 = vpop.f32.mrf.mxu0  ;;  %v4064_v60 = vmul.f32 %v4007_v51, %v3812_v42 }
 0x226   : > { %v4095_v37 = vadd.f32 %v4094_v0, %v4060_v56  ;;  %v3775_v31 = vadd.f32 %v6819_v39, %v3732_v45  ;;  %v4062_v7 = vmul.f32 %v3997_v13, %v3810_v34  ;;  %v3737_v48 = vadd.f32 %v5047_v15, %v3423_v10  ;;  %v4032_v5 = vpop.permute.xlu1 %4031  ;;  %v4111_v56 = vld [vmem:[%s289_s20] sm:$0x1] }
 0x227   : > { %v3688_v22 = vpop.f32.mrf.mxu0  ;;  %v3813_v2 = vmax.f32 %v3777_v38, 0.0  ;;  %v4129_v45 = vld [vmem:[%s6989_s6] sm:$0x1] }
 0x228   : > { %v3735_v12 = vadd.f32 %v3688_v22, %v3421_v16  ;;  %v4096_v11 = vadd.f32 %v4095_v37, %v4061_v19  ;;  %v3811_v3 = vmax.f32 %v3775_v31, 0.0  ;;  %v3780_v62 = vadd.f32 %v6819_v39, %v3737_v48 }
 0x229   : > { %v5048_v61 = vpop.f32.mrf.mxu0  ;;  %v4065_v28 = vmul.f32 %v4012_v27, %v3813_v2 }
 0x22a   : > { %v3778_v57 = vadd.f32 %v6819_v39, %v3735_v12  ;;  %v4097_v17 = vadd.f32 %v4096_v11, %v4062_v7  ;;  %v4063_v30 = vmul.f32 %v4002_v23, %v3811_v3  ;;  %v3738_v52 = vadd.f32 %v5048_v61, %v3424_v55 }
 0x22b   : > { %v3691_v26 = vpop.f32.mrf.mxu0  ;;  %v3816_v50 = vmax.f32 %v3780_v62, 0.0 }
 0x22c   : > { %v3736_v29 = vadd.f32 %v3691_v26, %v3422_v41  ;;  %v4098_v46 = vadd.f32 %v4097_v17, %v4063_v30  ;;  %v3814_v9 = vmax.f32 %v3778_v57, 0.0  ;;  %v3781_v63 = vadd.f32 %v6819_v39, %v3738_v52 }
 0x22d   : > { %v4068_v54 = vmul.f32 %v4027_v40, %v3816_v50 }
 0x22e   : > { %v3779_v49 = vadd.f32 %v6819_v39, %v3736_v29  ;;  %v4099_v35 = vadd.f32 %v4098_v46, %v4064_v60  ;;  %v4066_v36 = vmul.f32 %v4017_v32, %v3814_v9  ;;  %v3817_v13 = vmax.f32 %v3781_v63, 0.0 }
 0x230   : > { %v3815_v53 = vmax.f32 %v3779_v49, 0.0  ;;  %v4100_v6 = vadd.f32 %v4099_v35, %v4065_v28  ;;  %v4069_v47 = vmul.f32 %v4032_v5, %v3817_v13 }
 0x232   : > { %v4067_v58 = vmul.f32 %v4022_v21, %v3815_v53  ;;  %v4101_v59 = vadd.f32 %v4100_v6, %v4066_v36 }
 0x234   : > { %v4102_v24 = vadd.f32 %v4101_v59, %v4067_v58 }
 0x236   : > { %v4103_v25 = vadd.f32 %v4102_v24, %v4068_v54 }
 0x238   : > { %v4104_v33 = vadd.f32 %v4103_v25, %v4069_v47 }
 0x23a   : > { %v4105_v14 = vrot.slane %v4104_v33, 4 }
 0x23c   : > { %v4106_v39 = vadd.f32 %v4105_v14, %v4104_v33 }
 0x23e   : > { %v4107_v1 = vrot.slane %v4106_v39, 2 }
 0x240   : > { %v4108_v23 = vadd.f32 %v4107_v1, %v4106_v39 }
 0x242   : > { %v4109_v43 = vrot.slane %v4108_v23, 1 }
 0x244   : > { %v4110_v0 = vadd.f32 %v4109_v43, %v4108_v23 }
 0x246   : > { %v4112_v34 = vadd.f32 %v4111_v56, %v4110_v0 }
 0x248   : > { %5082 = vmatmul.mubr.f32.vlgmr.msra.gmra.mxu1 %v4112_v34 }
 0x308   : > { %v4196_v15 = vpop.f32.mrf.mxu1 }
 0x309   : > { %v4197_v19 = vadd.f32 %v4196_v15, %v4129_v45 }
 0x30a   : > { %v5083_v4 = vpop.f32.mrf.mxu1 }
 0x30b   : > { %4200 = vst [vmem:[%s281_s8] sm:$0x1] %v4197_v19 }
 0x30c   : > { %5216 = shalt.err (!%p5213_p3)
}
 0x30d   : > { %s5217_s20 = scalar_lea.hbm %s6948_s19, 16  ;;  %s5221_s23 = scalar_lea.hbm %s6990_s7, 32 }
 0x30e   : > { %p5218_p4 = scmp.ne.s32.totalorder %s6948_s19, %s5217_s20  ;;  %p5222_p9 = scmp.lt.s32.totalorder %s6948_s19, %s6990_s7 }
 0x30f   : > { %p5223_p10 = scmp.lt.s32.totalorder %s5221_s23, %s5217_s20 }
 0x310   : > { %p5219_p7 = pnand %p5218_p4, %p5347_p5 }
 0x311   : > { %p5224_p11 = por %p5223_p10, %p5222_p9 }
 0x312   : > { %p5220_p8 = pneg %p5219_p7 }
 0x314   : > { %p5225_p12 = pnand %p5224_p11, %p5220_p8 }
 0x316   : > { %5228 = shalt.err (!%p5225_p12)
}
 0x317   : > { %5097 = dma.vmem_to_hbm [thread:$0]  (%p5347_p5), %s4215_s9, 16, %s6948_s19, %s4202_s15  }
 0x318 PF: > { %p5103_p13 = scmp.ge.s32.totalorder %s5263_s27, 2  ;;  %s4226_s13 = sand.u32 1, %s5251_s24  }
 0x319   : > { %s4227_s14 = scalar_lea.sflag [#allocation3], %s4226_s13 }
 0x31a   : > { %p5100_p0 = pnand %p5103_p13, %p5351_p6 }
 0x31c   : > { %p5101_p1 = pneg %p5100_p0 }
 0x31e   : > { %5246 = dma.done.wait (%p5101_p1), %s4227_s14, 16  }
 0x31f   : > { %5248 = vsyncadd (%p5101_p1), %s4227_s14, 4294967280  ;;  %p17_p2 = scmp.ge.s32.totalorder %s5334_s30, 4   ;;  %s7041_s24 = smov %s5255_s25 }
 0x320   : > { %s7042_s25 = smov %s5259_s26  ;;  %s7043_s26 = smov %s5345_s10 }
 0x321   : > { %s7044_s27 = smov %s5334_s30  ;;  %19 = sbr.rel (!%p17_p2) target bundleno = 3 (0x3), region = 94 }
 0x326   :  { %4231 = vsyncpa [#allocation3], 1 }
 0x327   :  { %4233 = vsyncpa [#allocation3 + $0x1], 1 }

</bundles_post_ra>
